<compile_context>
chip_gen: v5e
topology: v5e:2x2
jax: 0.10.0
libtpu: 0.0.40
codegen_flags: <defaults>
</compile_context>

<pallas_src>
import math
import jax
import jax.numpy as jnp
from jax.experimental import pallas as pl
from jax.experimental.pallas import tpu as pltpu

N = 8     # batch (NSamples)
L = 8     # lags / sequence length
H1 = 32   # lstm1 hidden
H2 = 64   # lstm2 hidden


def _cell_ifog(gates, c):
    """LSTMCell nonlinearities on fully-summed gates in PERMUTED order [i|f|o|g].

    One sigmoid (via the tanh identity -> single EUP push) over the contiguous
    leading 3H lanes, one tanh over the trailing H lanes, one tanh on c_new:
    3 EUP pushes per cell.
    """
    H = c.shape[1]
    sig = 0.5 * (1.0 + jnp.tanh(0.5 * gates[:, 0:3 * H]))   # [i | f | o]
    g = jnp.tanh(gates[:, 3 * H:4 * H])
    i = sig[:, 0:H]
    f = sig[:, H:2 * H]
    o = sig[:, 2 * H:3 * H]
    c_new = f * c + i * g
    h_new = o * jnp.tanh(c_new)
    return h_new, c_new


def pooling_lstm_kernel(x_ref, h10_ref, c10_ref, h20_ref, c20_ref,
                        wih1_ref, whh1_ref, b1_ref,
                        wih2_ref, whh2_ref, b2_ref,
                        wlin_ref,
                        wpool_ref, bfold_ref,
                        out_ref):
    num_steps = x_ref.shape[0]   # L (static)
    batch = x_ref.shape[1]

    h1 = h10_ref[...]
    c1 = c10_ref[...]
    h2 = h20_ref[...]
    c2 = c20_ref[...]
    h2_acc = jnp.zeros((batch, h2.shape[1]), jnp.float32)   # sum_t wpool[t]*h2_t

    # Fully unrolled recurrence (static trip count == fori_loop unroll=True).
    # Weights/biases are read from VMEM refs inside the loop rather than kept
    # live as Python locals across all unrolled steps (vreg-pressure control).
    for t in range(num_steps):
        # Layer-2 recurrent contribution first: depends only on h2_{t-1}, so the
        # MXU push overlaps the layer-1 EUP chain below.
        g2_rec = jnp.dot(h2, whh2_ref[...],
                         preferred_element_type=jnp.float32) + b2_ref[...]

        # Layer 1: gates = x_t*Wih1 + b1 + h1 @ Whh1 (input_size==1 -> VPU mul).
        gates1 = (x_ref[t] * wih1_ref[...] + b1_ref[...]
                  + jnp.dot(h1, whh1_ref[...], preferred_element_type=jnp.float32))
        h1, c1 = _cell_ifog(gates1, c1)

        # Layer 2: gates = h1 @ Wih2 + (h2 @ Whh2 + b2)
        gates2 = jnp.dot(h1, wih2_ref[...],
                         preferred_element_type=jnp.float32) + g2_rec
        h2, c2 = _cell_ifog(gates2, c2)

        # Fold per-step output head + pooling into a single VPU FMA:
        #   predict = (sum_t wpool[t] * h2_t) @ wlin + (blin*sum(wpool) + bpool)
        h2_acc = h2_acc + h2 * wpool_ref[t]

    # Epilogue: single Linear(H2 -> 1) + precomputed folded bias (SMEM scalar).
    out = jnp.dot(h2_acc, wlin_ref[...], preferred_element_type=jnp.float32)
    out_ref[...] = out + bfold_ref[0]


def _permute_gate_cols(w):
    """Permute last-axis gate blocks from PyTorch [i|f|g|o] to [i|f|o|g]."""
    H = w.shape[-1] // 4
    return jnp.concatenate([w[..., :2 * H], w[..., 3 * H:4 * H], w[..., 2 * H:3 * H]],
                           axis=-1)


def pooling_lstm_forward(x, states, params):
    h10, c10, h20, c20 = states
    (wih1, whh1, b1, wih2, whh2, b2, wlin, blin, wpool, bpool) = params
    n, lags = x.shape
    h1n, h2n = whh1.shape[0], whh2.shape[0]
    x_tm = x.T.reshape(lags, n, 1)   # time-major (L, N, 1)

    # Gate-column permutation [i|f|g|o] -> [i|f|o|g] (weights AND biases, both cells).
    wih1_p, whh1_p, b1_p = map(_permute_gate_cols, (wih1, whh1, b1))
    wih2_p, whh2_p, b2_p = map(_permute_gate_cols, (wih2, whh2, b2))

    # Fold the per-step head bias + pooling bias into one scalar.
    bias_fold = (blin[0] * jnp.sum(wpool) + bpool[0]).reshape(1).astype(jnp.float32)

    vmem = pl.BlockSpec(memory_space=pltpu.MemorySpace.VMEM)
    smem = pl.BlockSpec(memory_space=pltpu.MemorySpace.SMEM)

    flops = int(lags * 2 * n * (4 * h1n * h1n + 4 * h1n * h2n + 4 * h2n * h2n)
                + 2 * n * h2n)
    transcendentals = int(lags * n * 5 * (h1n + h2n))
    bytes_in = 4 * (x_tm.size + h10.size + c10.size + h20.size + c20.size
                    + wih1.size + whh1.size + b1.size
                    + wih2.size + whh2.size + b2.size
                    + wlin.size + wpool.size + 1)
    bytes_accessed = int(bytes_in + 4 * n)

    # Everything (< 100 KiB) stays resident in VMEM/SMEM; no grid / pipelining.
    return pl.pallas_call(
        pooling_lstm_kernel,
        out_shape=jax.ShapeDtypeStruct((n, 1), jnp.float32),
        in_specs=[vmem] * 12 + [smem] * 2,
        out_specs=vmem,
        cost_estimate=pl.CostEstimate(flops=flops,
                                      transcendentals=transcendentals,
                                      bytes_accessed=bytes_accessed),
    )(x_tm, h10, c10, h20, c20,
      wih1_p, whh1_p, b1_p, wih2_p, whh2_p, b2_p,
      wlin, wpool, bias_fold)


def pooling_lstm_reference(x, states, params):
    """Pure-JAX reference mirroring the PyTorch forward (given the same h0/c0)."""
    h1, c1, h2, c2 = states
    (wih1, whh1, b1, wih2, whh2, b2, wlin, blin, wpool, bpool) = params

    def cell(x_gates, h, c, whh, b):
        H = h.shape[1]
        gates = x_gates + h @ whh + b
        i = jax.nn.sigmoid(gates[:, 0:H])
        f = jax.nn.sigmoid(gates[:, H:2 * H])
        g = jnp.tanh(gates[:, 2 * H:3 * H])
        o = jax.nn.sigmoid(gates[:, 3 * H:4 * H])
        c_new = f * c + i * g
        return o * jnp.tanh(c_new), c_new

    outs = []
    for t in range(x.shape[1]):
        xt = x[:, t:t + 1]
        h1, c1 = cell(xt @ wih1, h1, c1, whh1, b1)
        h2, c2 = cell(h1 @ wih2, h2, c2, whh2, b2)
        outs.append(h2 @ wlin + blin[0])
    out_seq = jnp.concatenate(outs, axis=1)           # (N, L)  (== stack+squeeze)
    return out_seq @ wpool.reshape(-1, 1) + bpool[0]  # (N, 1)  pooling Linear(L->1)


if __name__ == "__main__":
    key = jax.random.PRNGKey(0)
    ks = jax.random.split(key, 18)

    def uni(k, shape, bound):
        return jax.random.uniform(k, shape, jnp.float32, -bound, bound)

    k1 = 1.0 / math.sqrt(H1)
    k2 = 1.0 / math.sqrt(H2)
    kp = 1.0 / math.sqrt(L)

    # LSTMCell 1 (input_size=1, hidden=H1); weights stored transposed, gate order [i|f|g|o].
    wih1 = uni(ks[0], (1, 4 * H1), k1)
    whh1 = uni(ks[1], (H1, 4 * H1), k1)
    b1 = (uni(ks[2], (4 * H1,), k1) + uni(ks[3], (4 * H1,), k1)).reshape(1, 4 * H1)
    # LSTMCell 2 (input_size=H1, hidden=H2)
    wih2 = uni(ks[4], (H1, 4 * H2), k2)
    whh2 = uni(ks[5], (H2, 4 * H2), k2)
    b2 = (uni(ks[6], (4 * H2,), k2) + uni(ks[7], (4 * H2,), k2)).reshape(1, 4 * H2)
    # per-step Linear(H2 -> 1)
    wlin = uni(ks[8], (H2, 1), k2)
    blin = uni(ks[9], (1,), k2)
    # pooling Linear(L -> 1)
    wpool = uni(ks[10], (L,), kp)
    bpool = uni(ks[11], (1,), kp)
    params = (wih1, whh1, b1, wih2, whh2, b2, wlin, blin, wpool, bpool)

    # The PyTorch module draws random initial states each forward; we make them
    # deterministic inputs here.
    h10 = jax.random.normal(ks[12], (N, H1), jnp.float32)
    c10 = jax.random.normal(ks[13], (N, H1), jnp.float32)
    h20 = jax.random.normal(ks[14], (N, H2), jnp.float32)
    c20 = jax.random.normal(ks[15], (N, H2), jnp.float32)
    states = (h10, c10, h20, c20)

    x = jax.random.normal(ks[16], (N, L), jnp.float32)

    out = jax.block_until_ready(pooling_lstm_forward(x, states, params))
    ref = pooling_lstm_reference(x, states, params)

    assert out.shape == (N, 1), out.shape
    # Tolerance accounts for the tanh-based sigmoid and the head/pooling fold
    # (fp32 reassociation + few-ulp transcendental differences) while still
    # catching any real gate-order/permutation bug (those produce O(0.1) errors).
    assert jnp.allclose(out, ref, atol=1e-4, rtol=1e-4), (out, ref)
    print("KERNEL_OK")
</pallas_src>

<mosaic_0001>
module attributes {stable_mosaic.version = 11 : i64} {
  func.func @pooling_lstm_kernel(%arg0: memref<8x8x1xf32, #tpu.memory_space<vmem>>, %arg1: memref<8x32xf32, #tpu.memory_space<vmem>>, %arg2: memref<8x32xf32, #tpu.memory_space<vmem>>, %arg3: memref<8x64xf32, #tpu.memory_space<vmem>>, %arg4: memref<8x64xf32, #tpu.memory_space<vmem>>, %arg5: memref<1x128xf32, #tpu.memory_space<vmem>>, %arg6: memref<32x128xf32, #tpu.memory_space<vmem>>, %arg7: memref<1x128xf32, #tpu.memory_space<vmem>>, %arg8: memref<32x256xf32, #tpu.memory_space<vmem>>, %arg9: memref<64x256xf32, #tpu.memory_space<vmem>>, %arg10: memref<1x256xf32, #tpu.memory_space<vmem>>, %arg11: memref<64x1xf32, #tpu.memory_space<vmem>>, %arg12: memref<8xf32, #tpu.memory_space<smem>>, %arg13: memref<1xf32, #tpu.memory_space<smem>>, %arg14: memref<8x1xf32, #tpu.memory_space<vmem>>) attributes {dimension_semantics = [], scalar_prefetch = 0 : i64, scratch_operands = 0 : i64, tpu.core_type = #tpu.core_type<tc>} {
    %c0 = arith.constant 0 : index
    %c0_0 = arith.constant 0 : index
    %0 = vector.load %arg1[%c0, %c0_0] : memref<8x32xf32, #tpu.memory_space<vmem>>, vector<8x32xf32>
    %c0_1 = arith.constant 0 : index
    %c0_2 = arith.constant 0 : index
    %1 = vector.load %arg2[%c0_1, %c0_2] : memref<8x32xf32, #tpu.memory_space<vmem>>, vector<8x32xf32>
    %c0_3 = arith.constant 0 : index
    %c0_4 = arith.constant 0 : index
    %2 = vector.load %arg3[%c0_3, %c0_4] : memref<8x64xf32, #tpu.memory_space<vmem>>, vector<8x64xf32>
    %c0_5 = arith.constant 0 : index
    %c0_6 = arith.constant 0 : index
    %3 = vector.load %arg4[%c0_5, %c0_6] : memref<8x64xf32, #tpu.memory_space<vmem>>, vector<8x64xf32>
    %cst = arith.constant 0.000000e+00 : f32
    %4 = vector.broadcast %cst : f32 to vector<8x64xf32>
    %c0_7 = arith.constant 0 : index
    %c0_8 = arith.constant 0 : index
    %5 = vector.load %arg9[%c0_7, %c0_8] : memref<64x256xf32, #tpu.memory_space<vmem>>, vector<64x256xf32>
    %cst_9 = arith.constant dense<0.000000e+00> : vector<8x256xf32>
    %6 = tpu.matmul %2, %5, %cst_9 {dimension_numbers = #tpu.dot_dimension_numbers<[1], [0], [0], [1], [0, 0, 1, 1], [], []>} : vector<8x64xf32>, vector<64x256xf32>, vector<8x256xf32> -> vector<8x256xf32>
    %c0_10 = arith.constant 0 : index
    %c0_11 = arith.constant 0 : index
    %7 = vector.load %arg10[%c0_10, %c0_11] : memref<1x256xf32, #tpu.memory_space<vmem>>, vector<1x256xf32>
    %8 = vector.broadcast %7 : vector<1x256xf32> to vector<8x256xf32>
    %9 = arith.addf %6, %8 : vector<8x256xf32>
    %c0_12 = arith.constant 0 : index
    %c0_13 = arith.constant 0 : index
    %c0_14 = arith.constant 0 : index
    %10 = vector.load %arg0[%c0_12, %c0_13, %c0_14] : memref<8x8x1xf32, #tpu.memory_space<vmem>>, vector<1x8x1xf32>
    %11 = vector.shape_cast %10 : vector<1x8x1xf32> to vector<8x1xf32>
    %c0_15 = arith.constant 0 : index
    %c0_16 = arith.constant 0 : index
    %12 = vector.load %arg5[%c0_15, %c0_16] : memref<1x128xf32, #tpu.memory_space<vmem>>, vector<1x128xf32>
    %13 = vector.broadcast %11 : vector<8x1xf32> to vector<8x128xf32>
    %14 = vector.broadcast %12 : vector<1x128xf32> to vector<8x128xf32>
    %15 = arith.mulf %13, %14 : vector<8x128xf32>
    %c0_17 = arith.constant 0 : index
    %c0_18 = arith.constant 0 : index
    %16 = vector.load %arg7[%c0_17, %c0_18] : memref<1x128xf32, #tpu.memory_space<vmem>>, vector<1x128xf32>
    %17 = vector.broadcast %16 : vector<1x128xf32> to vector<8x128xf32>
    %18 = arith.addf %15, %17 : vector<8x128xf32>
    %c0_19 = arith.constant 0 : index
    %c0_20 = arith.constant 0 : index
    %19 = vector.load %arg6[%c0_19, %c0_20] : memref<32x128xf32, #tpu.memory_space<vmem>>, vector<32x128xf32>
    %cst_21 = arith.constant dense<0.000000e+00> : vector<8x128xf32>
    %20 = tpu.matmul %0, %19, %cst_21 {dimension_numbers = #tpu.dot_dimension_numbers<[1], [0], [0], [1], [0, 0, 1, 1], [], []>} : vector<8x32xf32>, vector<32x128xf32>, vector<8x128xf32> -> vector<8x128xf32>
    %21 = arith.addf %18, %20 : vector<8x128xf32>
    %22 = vector.extract_strided_slice %21 {offsets = [0, 0], sizes = [8, 96], strides = [1, 1]} : vector<8x128xf32> to vector<8x96xf32>
    %cst_22 = arith.constant 5.000000e-01 : f32
    %23 = vector.broadcast %cst_22 : f32 to vector<8x96xf32>
    %24 = arith.mulf %23, %22 : vector<8x96xf32>
    %25 = math.tanh %24 : vector<8x96xf32>
    %cst_23 = arith.constant 1.000000e+00 : f32
    %26 = vector.broadcast %cst_23 : f32 to vector<8x96xf32>
    %27 = arith.addf %26, %25 : vector<8x96xf32>
    %cst_24 = arith.constant 5.000000e-01 : f32
    %28 = vector.broadcast %cst_24 : f32 to vector<8x96xf32>
    %29 = arith.mulf %28, %27 : vector<8x96xf32>
    %30 = vector.extract_strided_slice %21 {offsets = [0, 96], sizes = [8, 32], strides = [1, 1]} : vector<8x128xf32> to vector<8x32xf32>
    %31 = math.tanh %30 : vector<8x32xf32>
    %32 = vector.extract_strided_slice %29 {offsets = [0, 0], sizes = [8, 32], strides = [1, 1]} : vector<8x96xf32> to vector<8x32xf32>
    %33 = vector.extract_strided_slice %29 {offsets = [0, 32], sizes = [8, 32], strides = [1, 1]} : vector<8x96xf32> to vector<8x32xf32>
    %34 = vector.extract_strided_slice %29 {offsets = [0, 64], sizes = [8, 32], strides = [1, 1]} : vector<8x96xf32> to vector<8x32xf32>
    %35 = arith.mulf %33, %1 : vector<8x32xf32>
    %36 = arith.mulf %32, %31 : vector<8x32xf32>
    %37 = arith.addf %35, %36 : vector<8x32xf32>
    %38 = math.tanh %37 : vector<8x32xf32>
    %39 = arith.mulf %34, %38 : vector<8x32xf32>
    %c0_25 = arith.constant 0 : index
    %c0_26 = arith.constant 0 : index
    %40 = vector.load %arg8[%c0_25, %c0_26] : memref<32x256xf32, #tpu.memory_space<vmem>>, vector<32x256xf32>
    %cst_27 = arith.constant dense<0.000000e+00> : vector<8x256xf32>
    %41 = tpu.matmul %39, %40, %cst_27 {dimension_numbers = #tpu.dot_dimension_numbers<[1], [0], [0], [1], [0, 0, 1, 1], [], []>} : vector<8x32xf32>, vector<32x256xf32>, vector<8x256xf32> -> vector<8x256xf32>
    %42 = arith.addf %41, %9 : vector<8x256xf32>
    %43 = vector.extract_strided_slice %42 {offsets = [0, 0], sizes = [8, 192], strides = [1, 1]} : vector<8x256xf32> to vector<8x192xf32>
    %cst_28 = arith.constant 5.000000e-01 : f32
    %44 = vector.broadcast %cst_28 : f32 to vector<8x192xf32>
    %45 = arith.mulf %44, %43 : vector<8x192xf32>
    %46 = math.tanh %45 : vector<8x192xf32>
    %cst_29 = arith.constant 1.000000e+00 : f32
    %47 = vector.broadcast %cst_29 : f32 to vector<8x192xf32>
    %48 = arith.addf %47, %46 : vector<8x192xf32>
    %cst_30 = arith.constant 5.000000e-01 : f32
    %49 = vector.broadcast %cst_30 : f32 to vector<8x192xf32>
    %50 = arith.mulf %49, %48 : vector<8x192xf32>
    %51 = vector.extract_strided_slice %42 {offsets = [0, 192], sizes = [8, 64], strides = [1, 1]} : vector<8x256xf32> to vector<8x64xf32>
    %52 = math.tanh %51 : vector<8x64xf32>
    %53 = vector.extract_strided_slice %50 {offsets = [0, 0], sizes = [8, 64], strides = [1, 1]} : vector<8x192xf32> to vector<8x64xf32>
    %54 = vector.extract_strided_slice %50 {offsets = [0, 64], sizes = [8, 64], strides = [1, 1]} : vector<8x192xf32> to vector<8x64xf32>
    %55 = vector.extract_strided_slice %50 {offsets = [0, 128], sizes = [8, 64], strides = [1, 1]} : vector<8x192xf32> to vector<8x64xf32>
    %56 = arith.mulf %54, %3 : vector<8x64xf32>
    %57 = arith.mulf %53, %52 : vector<8x64xf32>
    %58 = arith.addf %56, %57 : vector<8x64xf32>
    %59 = math.tanh %58 : vector<8x64xf32>
    %60 = arith.mulf %55, %59 : vector<8x64xf32>
    %c0_31 = arith.constant 0 : index
    %61 = memref.load %arg12[%c0_31] : memref<8xf32, #tpu.memory_space<smem>>
    %62 = vector.broadcast %61 : f32 to vector<8x64xf32>
    %63 = arith.mulf %60, %62 : vector<8x64xf32>
    %64 = arith.addf %4, %63 : vector<8x64xf32>
    %c0_32 = arith.constant 0 : index
    %c0_33 = arith.constant 0 : index
    %65 = vector.load %arg9[%c0_32, %c0_33] : memref<64x256xf32, #tpu.memory_space<vmem>>, vector<64x256xf32>
    %cst_34 = arith.constant dense<0.000000e+00> : vector<8x256xf32>
    %66 = tpu.matmul %60, %65, %cst_34 {dimension_numbers = #tpu.dot_dimension_numbers<[1], [0], [0], [1], [0, 0, 1, 1], [], []>} : vector<8x64xf32>, vector<64x256xf32>, vector<8x256xf32> -> vector<8x256xf32>
    %c0_35 = arith.constant 0 : index
    %c0_36 = arith.constant 0 : index
    %67 = vector.load %arg10[%c0_35, %c0_36] : memref<1x256xf32, #tpu.memory_space<vmem>>, vector<1x256xf32>
    %68 = vector.broadcast %67 : vector<1x256xf32> to vector<8x256xf32>
    %69 = arith.addf %66, %68 : vector<8x256xf32>
    %c1 = arith.constant 1 : index
    %c0_37 = arith.constant 0 : index
    %c0_38 = arith.constant 0 : index
    %70 = vector.load %arg0[%c1, %c0_37, %c0_38] : memref<8x8x1xf32, #tpu.memory_space<vmem>>, vector<1x8x1xf32>
    %71 = vector.shape_cast %70 : vector<1x8x1xf32> to vector<8x1xf32>
    %c0_39 = arith.constant 0 : index
    %c0_40 = arith.constant 0 : index
    %72 = vector.load %arg5[%c0_39, %c0_40] : memref<1x128xf32, #tpu.memory_space<vmem>>, vector<1x128xf32>
    %73 = vector.broadcast %71 : vector<8x1xf32> to vector<8x128xf32>
    %74 = vector.broadcast %72 : vector<1x128xf32> to vector<8x128xf32>
    %75 = arith.mulf %73, %74 : vector<8x128xf32>
    %c0_41 = arith.constant 0 : index
    %c0_42 = arith.constant 0 : index
    %76 = vector.load %arg7[%c0_41, %c0_42] : memref<1x128xf32, #tpu.memory_space<vmem>>, vector<1x128xf32>
    %77 = vector.broadcast %76 : vector<1x128xf32> to vector<8x128xf32>
    %78 = arith.addf %75, %77 : vector<8x128xf32>
    %c0_43 = arith.constant 0 : index
    %c0_44 = arith.constant 0 : index
    %79 = vector.load %arg6[%c0_43, %c0_44] : memref<32x128xf32, #tpu.memory_space<vmem>>, vector<32x128xf32>
    %cst_45 = arith.constant dense<0.000000e+00> : vector<8x128xf32>
    %80 = tpu.matmul %39, %79, %cst_45 {dimension_numbers = #tpu.dot_dimension_numbers<[1], [0], [0], [1], [0, 0, 1, 1], [], []>} : vector<8x32xf32>, vector<32x128xf32>, vector<8x128xf32> -> vector<8x128xf32>
    %81 = arith.addf %78, %80 : vector<8x128xf32>
    %82 = vector.extract_strided_slice %81 {offsets = [0, 0], sizes = [8, 96], strides = [1, 1]} : vector<8x128xf32> to vector<8x96xf32>
    %cst_46 = arith.constant 5.000000e-01 : f32
    %83 = vector.broadcast %cst_46 : f32 to vector<8x96xf32>
    %84 = arith.mulf %83, %82 : vector<8x96xf32>
    %85 = math.tanh %84 : vector<8x96xf32>
    %cst_47 = arith.constant 1.000000e+00 : f32
    %86 = vector.broadcast %cst_47 : f32 to vector<8x96xf32>
    %87 = arith.addf %86, %85 : vector<8x96xf32>
    %cst_48 = arith.constant 5.000000e-01 : f32
    %88 = vector.broadcast %cst_48 : f32 to vector<8x96xf32>
    %89 = arith.mulf %88, %87 : vector<8x96xf32>
    %90 = vector.extract_strided_slice %81 {offsets = [0, 96], sizes = [8, 32], strides = [1, 1]} : vector<8x128xf32> to vector<8x32xf32>
    %91 = math.tanh %90 : vector<8x32xf32>
    %92 = vector.extract_strided_slice %89 {offsets = [0, 0], sizes = [8, 32], strides = [1, 1]} : vector<8x96xf32> to vector<8x32xf32>
    %93 = vector.extract_strided_slice %89 {offsets = [0, 32], sizes = [8, 32], strides = [1, 1]} : vector<8x96xf32> to vector<8x32xf32>
    %94 = vector.extract_strided_slice %89 {offsets = [0, 64], sizes = [8, 32], strides = [1, 1]} : vector<8x96xf32> to vector<8x32xf32>
    %95 = arith.mulf %93, %37 : vector<8x32xf32>
    %96 = arith.mulf %92, %91 : vector<8x32xf32>
    %97 = arith.addf %95, %96 : vector<8x32xf32>
    %98 = math.tanh %97 : vector<8x32xf32>
    %99 = arith.mulf %94, %98 : vector<8x32xf32>
    %c0_49 = arith.constant 0 : index
    %c0_50 = arith.constant 0 : index
    %100 = vector.load %arg8[%c0_49, %c0_50] : memref<32x256xf32, #tpu.memory_space<vmem>>, vector<32x256xf32>
    %cst_51 = arith.constant dense<0.000000e+00> : vector<8x256xf32>
    %101 = tpu.matmul %99, %100, %cst_51 {dimension_numbers = #tpu.dot_dimension_numbers<[1], [0], [0], [1], [0, 0, 1, 1], [], []>} : vector<8x32xf32>, vector<32x256xf32>, vector<8x256xf32> -> vector<8x256xf32>
    %102 = arith.addf %101, %69 : vector<8x256xf32>
    %103 = vector.extract_strided_slice %102 {offsets = [0, 0], sizes = [8, 192], strides = [1, 1]} : vector<8x256xf32> to vector<8x192xf32>
    %cst_52 = arith.constant 5.000000e-01 : f32
    %104 = vector.broadcast %cst_52 : f32 to vector<8x192xf32>
    %105 = arith.mulf %104, %103 : vector<8x192xf32>
    %106 = math.tanh %105 : vector<8x192xf32>
    %cst_53 = arith.constant 1.000000e+00 : f32
    %107 = vector.broadcast %cst_53 : f32 to vector<8x192xf32>
    %108 = arith.addf %107, %106 : vector<8x192xf32>
    %cst_54 = arith.constant 5.000000e-01 : f32
    %109 = vector.broadcast %cst_54 : f32 to vector<8x192xf32>
    %110 = arith.mulf %109, %108 : vector<8x192xf32>
    %111 = vector.extract_strided_slice %102 {offsets = [0, 192], sizes = [8, 64], strides = [1, 1]} : vector<8x256xf32> to vector<8x64xf32>
    %112 = math.tanh %111 : vector<8x64xf32>
    %113 = vector.extract_strided_slice %110 {offsets = [0, 0], sizes = [8, 64], strides = [1, 1]} : vector<8x192xf32> to vector<8x64xf32>
    %114 = vector.extract_strided_slice %110 {offsets = [0, 64], sizes = [8, 64], strides = [1, 1]} : vector<8x192xf32> to vector<8x64xf32>
    %115 = vector.extract_strided_slice %110 {offsets = [0, 128], sizes = [8, 64], strides = [1, 1]} : vector<8x192xf32> to vector<8x64xf32>
    %116 = arith.mulf %114, %58 : vector<8x64xf32>
    %117 = arith.mulf %113, %112 : vector<8x64xf32>
    %118 = arith.addf %116, %117 : vector<8x64xf32>
    %119 = math.tanh %118 : vector<8x64xf32>
    %120 = arith.mulf %115, %119 : vector<8x64xf32>
    %c1_55 = arith.constant 1 : index
    %121 = memref.load %arg12[%c1_55] : memref<8xf32, #tpu.memory_space<smem>>
    %122 = vector.broadcast %121 : f32 to vector<8x64xf32>
    %123 = arith.mulf %120, %122 : vector<8x64xf32>
    %124 = arith.addf %64, %123 : vector<8x64xf32>
    %c0_56 = arith.constant 0 : index
    %c0_57 = arith.constant 0 : index
    %125 = vector.load %arg9[%c0_56, %c0_57] : memref<64x256xf32, #tpu.memory_space<vmem>>, vector<64x256xf32>
    %cst_58 = arith.constant dense<0.000000e+00> : vector<8x256xf32>
    %126 = tpu.matmul %120, %125, %cst_58 {dimension_numbers = #tpu.dot_dimension_numbers<[1], [0], [0], [1], [0, 0, 1, 1], [], []>} : vector<8x64xf32>, vector<64x256xf32>, vector<8x256xf32> -> vector<8x256xf32>
    %c0_59 = arith.constant 0 : index
    %c0_60 = arith.constant 0 : index
    %127 = vector.load %arg10[%c0_59, %c0_60] : memref<1x256xf32, #tpu.memory_space<vmem>>, vector<1x256xf32>
    %128 = vector.broadcast %127 : vector<1x256xf32> to vector<8x256xf32>
    %129 = arith.addf %126, %128 : vector<8x256xf32>
    %c2 = arith.constant 2 : index
    %c0_61 = arith.constant 0 : index
    %c0_62 = arith.constant 0 : index
    %130 = vector.load %arg0[%c2, %c0_61, %c0_62] : memref<8x8x1xf32, #tpu.memory_space<vmem>>, vector<1x8x1xf32>
    %131 = vector.shape_cast %130 : vector<1x8x1xf32> to vector<8x1xf32>
    %c0_63 = arith.constant 0 : index
    %c0_64 = arith.constant 0 : index
    %132 = vector.load %arg5[%c0_63, %c0_64] : memref<1x128xf32, #tpu.memory_space<vmem>>, vector<1x128xf32>
    %133 = vector.broadcast %131 : vector<8x1xf32> to vector<8x128xf32>
    %134 = vector.broadcast %132 : vector<1x128xf32> to vector<8x128xf32>
    %135 = arith.mulf %133, %134 : vector<8x128xf32>
    %c0_65 = arith.constant 0 : index
    %c0_66 = arith.constant 0 : index
    %136 = vector.load %arg7[%c0_65, %c0_66] : memref<1x128xf32, #tpu.memory_space<vmem>>, vector<1x128xf32>
    %137 = vector.broadcast %136 : vector<1x128xf32> to vector<8x128xf32>
    %138 = arith.addf %135, %137 : vector<8x128xf32>
    %c0_67 = arith.constant 0 : index
    %c0_68 = arith.constant 0 : index
    %139 = vector.load %arg6[%c0_67, %c0_68] : memref<32x128xf32, #tpu.memory_space<vmem>>, vector<32x128xf32>
    %cst_69 = arith.constant dense<0.000000e+00> : vector<8x128xf32>
    %140 = tpu.matmul %99, %139, %cst_69 {dimension_numbers = #tpu.dot_dimension_numbers<[1], [0], [0], [1], [0, 0, 1, 1], [], []>} : vector<8x32xf32>, vector<32x128xf32>, vector<8x128xf32> -> vector<8x128xf32>
    %141 = arith.addf %138, %140 : vector<8x128xf32>
    %142 = vector.extract_strided_slice %141 {offsets = [0, 0], sizes = [8, 96], strides = [1, 1]} : vector<8x128xf32> to vector<8x96xf32>
    %cst_70 = arith.constant 5.000000e-01 : f32
    %143 = vector.broadcast %cst_70 : f32 to vector<8x96xf32>
    %144 = arith.mulf %143, %142 : vector<8x96xf32>
    %145 = math.tanh %144 : vector<8x96xf32>
    %cst_71 = arith.constant 1.000000e+00 : f32
    %146 = vector.broadcast %cst_71 : f32 to vector<8x96xf32>
    %147 = arith.addf %146, %145 : vector<8x96xf32>
    %cst_72 = arith.constant 5.000000e-01 : f32
    %148 = vector.broadcast %cst_72 : f32 to vector<8x96xf32>
    %149 = arith.mulf %148, %147 : vector<8x96xf32>
    %150 = vector.extract_strided_slice %141 {offsets = [0, 96], sizes = [8, 32], strides = [1, 1]} : vector<8x128xf32> to vector<8x32xf32>
    %151 = math.tanh %150 : vector<8x32xf32>
    %152 = vector.extract_strided_slice %149 {offsets = [0, 0], sizes = [8, 32], strides = [1, 1]} : vector<8x96xf32> to vector<8x32xf32>
    %153 = vector.extract_strided_slice %149 {offsets = [0, 32], sizes = [8, 32], strides = [1, 1]} : vector<8x96xf32> to vector<8x32xf32>
    %154 = vector.extract_strided_slice %149 {offsets = [0, 64], sizes = [8, 32], strides = [1, 1]} : vector<8x96xf32> to vector<8x32xf32>
    %155 = arith.mulf %153, %97 : vector<8x32xf32>
    %156 = arith.mulf %152, %151 : vector<8x32xf32>
    %157 = arith.addf %155, %156 : vector<8x32xf32>
    %158 = math.tanh %157 : vector<8x32xf32>
    %159 = arith.mulf %154, %158 : vector<8x32xf32>
    %c0_73 = arith.constant 0 : index
    %c0_74 = arith.constant 0 : index
    %160 = vector.load %arg8[%c0_73, %c0_74] : memref<32x256xf32, #tpu.memory_space<vmem>>, vector<32x256xf32>
    %cst_75 = arith.constant dense<0.000000e+00> : vector<8x256xf32>
    %161 = tpu.matmul %159, %160, %cst_75 {dimension_numbers = #tpu.dot_dimension_numbers<[1], [0], [0], [1], [0, 0, 1, 1], [], []>} : vector<8x32xf32>, vector<32x256xf32>, vector<8x256xf32> -> vector<8x256xf32>
    %162 = arith.addf %161, %129 : vector<8x256xf32>
    %163 = vector.extract_strided_slice %162 {offsets = [0, 0], sizes = [8, 192], strides = [1, 1]} : vector<8x256xf32> to vector<8x192xf32>
    %cst_76 = arith.constant 5.000000e-01 : f32
    %164 = vector.broadcast %cst_76 : f32 to vector<8x192xf32>
    %165 = arith.mulf %164, %163 : vector<8x192xf32>
    %166 = math.tanh %165 : vector<8x192xf32>
    %cst_77 = arith.constant 1.000000e+00 : f32
    %167 = vector.broadcast %cst_77 : f32 to vector<8x192xf32>
    %168 = arith.addf %167, %166 : vector<8x192xf32>
    %cst_78 = arith.constant 5.000000e-01 : f32
    %169 = vector.broadcast %cst_78 : f32 to vector<8x192xf32>
    %170 = arith.mulf %169, %168 : vector<8x192xf32>
    %171 = vector.extract_strided_slice %162 {offsets = [0, 192], sizes = [8, 64], strides = [1, 1]} : vector<8x256xf32> to vector<8x64xf32>
    %172 = math.tanh %171 : vector<8x64xf32>
    %173 = vector.extract_strided_slice %170 {offsets = [0, 0], sizes = [8, 64], strides = [1, 1]} : vector<8x192xf32> to vector<8x64xf32>
    %174 = vector.extract_strided_slice %170 {offsets = [0, 64], sizes = [8, 64], strides = [1, 1]} : vector<8x192xf32> to vector<8x64xf32>
    %175 = vector.extract_strided_slice %170 {offsets = [0, 128], sizes = [8, 64], strides = [1, 1]} : vector<8x192xf32> to vector<8x64xf32>
    %176 = arith.mulf %174, %118 : vector<8x64xf32>
    %177 = arith.mulf %173, %172 : vector<8x64xf32>
    %178 = arith.addf %176, %177 : vector<8x64xf32>
    %179 = math.tanh %178 : vector<8x64xf32>
    %180 = arith.mulf %175, %179 : vector<8x64xf32>
    %c2_79 = arith.constant 2 : index
    %181 = memref.load %arg12[%c2_79] : memref<8xf32, #tpu.memory_space<smem>>
    %182 = vector.broadcast %181 : f32 to vector<8x64xf32>
    %183 = arith.mulf %180, %182 : vector<8x64xf32>
    %184 = arith.addf %124, %183 : vector<8x64xf32>
    %c0_80 = arith.constant 0 : index
    %c0_81 = arith.constant 0 : index
    %185 = vector.load %arg9[%c0_80, %c0_81] : memref<64x256xf32, #tpu.memory_space<vmem>>, vector<64x256xf32>
    %cst_82 = arith.constant dense<0.000000e+00> : vector<8x256xf32>
    %186 = tpu.matmul %180, %185, %cst_82 {dimension_numbers = #tpu.dot_dimension_numbers<[1], [0], [0], [1], [0, 0, 1, 1], [], []>} : vector<8x64xf32>, vector<64x256xf32>, vector<8x256xf32> -> vector<8x256xf32>
    %c0_83 = arith.constant 0 : index
    %c0_84 = arith.constant 0 : index
    %187 = vector.load %arg10[%c0_83, %c0_84] : memref<1x256xf32, #tpu.memory_space<vmem>>, vector<1x256xf32>
    %188 = vector.broadcast %187 : vector<1x256xf32> to vector<8x256xf32>
    %189 = arith.addf %186, %188 : vector<8x256xf32>
    %c3 = arith.constant 3 : index
    %c0_85 = arith.constant 0 : index
    %c0_86 = arith.constant 0 : index
    %190 = vector.load %arg0[%c3, %c0_85, %c0_86] : memref<8x8x1xf32, #tpu.memory_space<vmem>>, vector<1x8x1xf32>
    %191 = vector.shape_cast %190 : vector<1x8x1xf32> to vector<8x1xf32>
    %c0_87 = arith.constant 0 : index
    %c0_88 = arith.constant 0 : index
    %192 = vector.load %arg5[%c0_87, %c0_88] : memref<1x128xf32, #tpu.memory_space<vmem>>, vector<1x128xf32>
    %193 = vector.broadcast %191 : vector<8x1xf32> to vector<8x128xf32>
    %194 = vector.broadcast %192 : vector<1x128xf32> to vector<8x128xf32>
    %195 = arith.mulf %193, %194 : vector<8x128xf32>
    %c0_89 = arith.constant 0 : index
    %c0_90 = arith.constant 0 : index
    %196 = vector.load %arg7[%c0_89, %c0_90] : memref<1x128xf32, #tpu.memory_space<vmem>>, vector<1x128xf32>
    %197 = vector.broadcast %196 : vector<1x128xf32> to vector<8x128xf32>
    %198 = arith.addf %195, %197 : vector<8x128xf32>
    %c0_91 = arith.constant 0 : index
    %c0_92 = arith.constant 0 : index
    %199 = vector.load %arg6[%c0_91, %c0_92] : memref<32x128xf32, #tpu.memory_space<vmem>>, vector<32x128xf32>
    %cst_93 = arith.constant dense<0.000000e+00> : vector<8x128xf32>
    %200 = tpu.matmul %159, %199, %cst_93 {dimension_numbers = #tpu.dot_dimension_numbers<[1], [0], [0], [1], [0, 0, 1, 1], [], []>} : vector<8x32xf32>, vector<32x128xf32>, vector<8x128xf32> -> vector<8x128xf32>
    %201 = arith.addf %198, %200 : vector<8x128xf32>
    %202 = vector.extract_strided_slice %201 {offsets = [0, 0], sizes = [8, 96], strides = [1, 1]} : vector<8x128xf32> to vector<8x96xf32>
    %cst_94 = arith.constant 5.000000e-01 : f32
    %203 = vector.broadcast %cst_94 : f32 to vector<8x96xf32>
    %204 = arith.mulf %203, %202 : vector<8x96xf32>
    %205 = math.tanh %204 : vector<8x96xf32>
    %cst_95 = arith.constant 1.000000e+00 : f32
    %206 = vector.broadcast %cst_95 : f32 to vector<8x96xf32>
    %207 = arith.addf %206, %205 : vector<8x96xf32>
    %cst_96 = arith.constant 5.000000e-01 : f32
    %208 = vector.broadcast %cst_96 : f32 to vector<8x96xf32>
    %209 = arith.mulf %208, %207 : vector<8x96xf32>
    %210 = vector.extract_strided_slice %201 {offsets = [0, 96], sizes = [8, 32], strides = [1, 1]} : vector<8x128xf32> to vector<8x32xf32>
    %211 = math.tanh %210 : vector<8x32xf32>
    %212 = vector.extract_strided_slice %209 {offsets = [0, 0], sizes = [8, 32], strides = [1, 1]} : vector<8x96xf32> to vector<8x32xf32>
    %213 = vector.extract_strided_slice %209 {offsets = [0, 32], sizes = [8, 32], strides = [1, 1]} : vector<8x96xf32> to vector<8x32xf32>
    %214 = vector.extract_strided_slice %209 {offsets = [0, 64], sizes = [8, 32], strides = [1, 1]} : vector<8x96xf32> to vector<8x32xf32>
    %215 = arith.mulf %213, %157 : vector<8x32xf32>
    %216 = arith.mulf %212, %211 : vector<8x32xf32>
    %217 = arith.addf %215, %216 : vector<8x32xf32>
    %218 = math.tanh %217 : vector<8x32xf32>
    %219 = arith.mulf %214, %218 : vector<8x32xf32>
    %c0_97 = arith.constant 0 : index
    %c0_98 = arith.constant 0 : index
    %220 = vector.load %arg8[%c0_97, %c0_98] : memref<32x256xf32, #tpu.memory_space<vmem>>, vector<32x256xf32>
    %cst_99 = arith.constant dense<0.000000e+00> : vector<8x256xf32>
    %221 = tpu.matmul %219, %220, %cst_99 {dimension_numbers = #tpu.dot_dimension_numbers<[1], [0], [0], [1], [0, 0, 1, 1], [], []>} : vector<8x32xf32>, vector<32x256xf32>, vector<8x256xf32> -> vector<8x256xf32>
    %222 = arith.addf %221, %189 : vector<8x256xf32>
    %223 = vector.extract_strided_slice %222 {offsets = [0, 0], sizes = [8, 192], strides = [1, 1]} : vector<8x256xf32> to vector<8x192xf32>
    %cst_100 = arith.constant 5.000000e-01 : f32
    %224 = vector.broadcast %cst_100 : f32 to vector<8x192xf32>
    %225 = arith.mulf %224, %223 : vector<8x192xf32>
    %226 = math.tanh %225 : vector<8x192xf32>
    %cst_101 = arith.constant 1.000000e+00 : f32
    %227 = vector.broadcast %cst_101 : f32 to vector<8x192xf32>
    %228 = arith.addf %227, %226 : vector<8x192xf32>
    %cst_102 = arith.constant 5.000000e-01 : f32
    %229 = vector.broadcast %cst_102 : f32 to vector<8x192xf32>
    %230 = arith.mulf %229, %228 : vector<8x192xf32>
    %231 = vector.extract_strided_slice %222 {offsets = [0, 192], sizes = [8, 64], strides = [1, 1]} : vector<8x256xf32> to vector<8x64xf32>
    %232 = math.tanh %231 : vector<8x64xf32>
    %233 = vector.extract_strided_slice %230 {offsets = [0, 0], sizes = [8, 64], strides = [1, 1]} : vector<8x192xf32> to vector<8x64xf32>
    %234 = vector.extract_strided_slice %230 {offsets = [0, 64], sizes = [8, 64], strides = [1, 1]} : vector<8x192xf32> to vector<8x64xf32>
    %235 = vector.extract_strided_slice %230 {offsets = [0, 128], sizes = [8, 64], strides = [1, 1]} : vector<8x192xf32> to vector<8x64xf32>
    %236 = arith.mulf %234, %178 : vector<8x64xf32>
    %237 = arith.mulf %233, %232 : vector<8x64xf32>
    %238 = arith.addf %236, %237 : vector<8x64xf32>
    %239 = math.tanh %238 : vector<8x64xf32>
    %240 = arith.mulf %235, %239 : vector<8x64xf32>
    %c3_103 = arith.constant 3 : index
    %241 = memref.load %arg12[%c3_103] : memref<8xf32, #tpu.memory_space<smem>>
    %242 = vector.broadcast %241 : f32 to vector<8x64xf32>
    %243 = arith.mulf %240, %242 : vector<8x64xf32>
    %244 = arith.addf %184, %243 : vector<8x64xf32>
    %c0_104 = arith.constant 0 : index
    %c0_105 = arith.constant 0 : index
    %245 = vector.load %arg9[%c0_104, %c0_105] : memref<64x256xf32, #tpu.memory_space<vmem>>, vector<64x256xf32>
    %cst_106 = arith.constant dense<0.000000e+00> : vector<8x256xf32>
    %246 = tpu.matmul %240, %245, %cst_106 {dimension_numbers = #tpu.dot_dimension_numbers<[1], [0], [0], [1], [0, 0, 1, 1], [], []>} : vector<8x64xf32>, vector<64x256xf32>, vector<8x256xf32> -> vector<8x256xf32>
    %c0_107 = arith.constant 0 : index
    %c0_108 = arith.constant 0 : index
    %247 = vector.load %arg10[%c0_107, %c0_108] : memref<1x256xf32, #tpu.memory_space<vmem>>, vector<1x256xf32>
    %248 = vector.broadcast %247 : vector<1x256xf32> to vector<8x256xf32>
    %249 = arith.addf %246, %248 : vector<8x256xf32>
    %c4 = arith.constant 4 : index
    %c0_109 = arith.constant 0 : index
    %c0_110 = arith.constant 0 : index
    %250 = vector.load %arg0[%c4, %c0_109, %c0_110] : memref<8x8x1xf32, #tpu.memory_space<vmem>>, vector<1x8x1xf32>
    %251 = vector.shape_cast %250 : vector<1x8x1xf32> to vector<8x1xf32>
    %c0_111 = arith.constant 0 : index
    %c0_112 = arith.constant 0 : index
    %252 = vector.load %arg5[%c0_111, %c0_112] : memref<1x128xf32, #tpu.memory_space<vmem>>, vector<1x128xf32>
    %253 = vector.broadcast %251 : vector<8x1xf32> to vector<8x128xf32>
    %254 = vector.broadcast %252 : vector<1x128xf32> to vector<8x128xf32>
    %255 = arith.mulf %253, %254 : vector<8x128xf32>
    %c0_113 = arith.constant 0 : index
    %c0_114 = arith.constant 0 : index
    %256 = vector.load %arg7[%c0_113, %c0_114] : memref<1x128xf32, #tpu.memory_space<vmem>>, vector<1x128xf32>
    %257 = vector.broadcast %256 : vector<1x128xf32> to vector<8x128xf32>
    %258 = arith.addf %255, %257 : vector<8x128xf32>
    %c0_115 = arith.constant 0 : index
    %c0_116 = arith.constant 0 : index
    %259 = vector.load %arg6[%c0_115, %c0_116] : memref<32x128xf32, #tpu.memory_space<vmem>>, vector<32x128xf32>
    %cst_117 = arith.constant dense<0.000000e+00> : vector<8x128xf32>
    %260 = tpu.matmul %219, %259, %cst_117 {dimension_numbers = #tpu.dot_dimension_numbers<[1], [0], [0], [1], [0, 0, 1, 1], [], []>} : vector<8x32xf32>, vector<32x128xf32>, vector<8x128xf32> -> vector<8x128xf32>
    %261 = arith.addf %258, %260 : vector<8x128xf32>
    %262 = vector.extract_strided_slice %261 {offsets = [0, 0], sizes = [8, 96], strides = [1, 1]} : vector<8x128xf32> to vector<8x96xf32>
    %cst_118 = arith.constant 5.000000e-01 : f32
    %263 = vector.broadcast %cst_118 : f32 to vector<8x96xf32>
    %264 = arith.mulf %263, %262 : vector<8x96xf32>
    %265 = math.tanh %264 : vector<8x96xf32>
    %cst_119 = arith.constant 1.000000e+00 : f32
    %266 = vector.broadcast %cst_119 : f32 to vector<8x96xf32>
    %267 = arith.addf %266, %265 : vector<8x96xf32>
    %cst_120 = arith.constant 5.000000e-01 : f32
    %268 = vector.broadcast %cst_120 : f32 to vector<8x96xf32>
    %269 = arith.mulf %268, %267 : vector<8x96xf32>
    %270 = vector.extract_strided_slice %261 {offsets = [0, 96], sizes = [8, 32], strides = [1, 1]} : vector<8x128xf32> to vector<8x32xf32>
    %271 = math.tanh %270 : vector<8x32xf32>
    %272 = vector.extract_strided_slice %269 {offsets = [0, 0], sizes = [8, 32], strides = [1, 1]} : vector<8x96xf32> to vector<8x32xf32>
    %273 = vector.extract_strided_slice %269 {offsets = [0, 32], sizes = [8, 32], strides = [1, 1]} : vector<8x96xf32> to vector<8x32xf32>
    %274 = vector.extract_strided_slice %269 {offsets = [0, 64], sizes = [8, 32], strides = [1, 1]} : vector<8x96xf32> to vector<8x32xf32>
    %275 = arith.mulf %273, %217 : vector<8x32xf32>
    %276 = arith.mulf %272, %271 : vector<8x32xf32>
    %277 = arith.addf %275, %276 : vector<8x32xf32>
    %278 = math.tanh %277 : vector<8x32xf32>
    %279 = arith.mulf %274, %278 : vector<8x32xf32>
    %c0_121 = arith.constant 0 : index
    %c0_122 = arith.constant 0 : index
    %280 = vector.load %arg8[%c0_121, %c0_122] : memref<32x256xf32, #tpu.memory_space<vmem>>, vector<32x256xf32>
    %cst_123 = arith.constant dense<0.000000e+00> : vector<8x256xf32>
    %281 = tpu.matmul %279, %280, %cst_123 {dimension_numbers = #tpu.dot_dimension_numbers<[1], [0], [0], [1], [0, 0, 1, 1], [], []>} : vector<8x32xf32>, vector<32x256xf32>, vector<8x256xf32> -> vector<8x256xf32>
    %282 = arith.addf %281, %249 : vector<8x256xf32>
    %283 = vector.extract_strided_slice %282 {offsets = [0, 0], sizes = [8, 192], strides = [1, 1]} : vector<8x256xf32> to vector<8x192xf32>
    %cst_124 = arith.constant 5.000000e-01 : f32
    %284 = vector.broadcast %cst_124 : f32 to vector<8x192xf32>
    %285 = arith.mulf %284, %283 : vector<8x192xf32>
    %286 = math.tanh %285 : vector<8x192xf32>
    %cst_125 = arith.constant 1.000000e+00 : f32
    %287 = vector.broadcast %cst_125 : f32 to vector<8x192xf32>
    %288 = arith.addf %287, %286 : vector<8x192xf32>
    %cst_126 = arith.constant 5.000000e-01 : f32
    %289 = vector.broadcast %cst_126 : f32 to vector<8x192xf32>
    %290 = arith.mulf %289, %288 : vector<8x192xf32>
    %291 = vector.extract_strided_slice %282 {offsets = [0, 192], sizes = [8, 64], strides = [1, 1]} : vector<8x256xf32> to vector<8x64xf32>
    %292 = math.tanh %291 : vector<8x64xf32>
    %293 = vector.extract_strided_slice %290 {offsets = [0, 0], sizes = [8, 64], strides = [1, 1]} : vector<8x192xf32> to vector<8x64xf32>
    %294 = vector.extract_strided_slice %290 {offsets = [0, 64], sizes = [8, 64], strides = [1, 1]} : vector<8x192xf32> to vector<8x64xf32>
    %295 = vector.extract_strided_slice %290 {offsets = [0, 128], sizes = [8, 64], strides = [1, 1]} : vector<8x192xf32> to vector<8x64xf32>
    %296 = arith.mulf %294, %238 : vector<8x64xf32>
    %297 = arith.mulf %293, %292 : vector<8x64xf32>
    %298 = arith.addf %296, %297 : vector<8x64xf32>
    %299 = math.tanh %298 : vector<8x64xf32>
    %300 = arith.mulf %295, %299 : vector<8x64xf32>
    %c4_127 = arith.constant 4 : index
    %301 = memref.load %arg12[%c4_127] : memref<8xf32, #tpu.memory_space<smem>>
    %302 = vector.broadcast %301 : f32 to vector<8x64xf32>
    %303 = arith.mulf %300, %302 : vector<8x64xf32>
    %304 = arith.addf %244, %303 : vector<8x64xf32>
    %c0_128 = arith.constant 0 : index
    %c0_129 = arith.constant 0 : index
    %305 = vector.load %arg9[%c0_128, %c0_129] : memref<64x256xf32, #tpu.memory_space<vmem>>, vector<64x256xf32>
    %cst_130 = arith.constant dense<0.000000e+00> : vector<8x256xf32>
    %306 = tpu.matmul %300, %305, %cst_130 {dimension_numbers = #tpu.dot_dimension_numbers<[1], [0], [0], [1], [0, 0, 1, 1], [], []>} : vector<8x64xf32>, vector<64x256xf32>, vector<8x256xf32> -> vector<8x256xf32>
    %c0_131 = arith.constant 0 : index
    %c0_132 = arith.constant 0 : index
    %307 = vector.load %arg10[%c0_131, %c0_132] : memref<1x256xf32, #tpu.memory_space<vmem>>, vector<1x256xf32>
    %308 = vector.broadcast %307 : vector<1x256xf32> to vector<8x256xf32>
    %309 = arith.addf %306, %308 : vector<8x256xf32>
    %c5 = arith.constant 5 : index
    %c0_133 = arith.constant 0 : index
    %c0_134 = arith.constant 0 : index
    %310 = vector.load %arg0[%c5, %c0_133, %c0_134] : memref<8x8x1xf32, #tpu.memory_space<vmem>>, vector<1x8x1xf32>
    %311 = vector.shape_cast %310 : vector<1x8x1xf32> to vector<8x1xf32>
    %c0_135 = arith.constant 0 : index
    %c0_136 = arith.constant 0 : index
    %312 = vector.load %arg5[%c0_135, %c0_136] : memref<1x128xf32, #tpu.memory_space<vmem>>, vector<1x128xf32>
    %313 = vector.broadcast %311 : vector<8x1xf32> to vector<8x128xf32>
    %314 = vector.broadcast %312 : vector<1x128xf32> to vector<8x128xf32>
    %315 = arith.mulf %313, %314 : vector<8x128xf32>
    %c0_137 = arith.constant 0 : index
    %c0_138 = arith.constant 0 : index
    %316 = vector.load %arg7[%c0_137, %c0_138] : memref<1x128xf32, #tpu.memory_space<vmem>>, vector<1x128xf32>
    %317 = vector.broadcast %316 : vector<1x128xf32> to vector<8x128xf32>
    %318 = arith.addf %315, %317 : vector<8x128xf32>
    %c0_139 = arith.constant 0 : index
    %c0_140 = arith.constant 0 : index
    %319 = vector.load %arg6[%c0_139, %c0_140] : memref<32x128xf32, #tpu.memory_space<vmem>>, vector<32x128xf32>
    %cst_141 = arith.constant dense<0.000000e+00> : vector<8x128xf32>
    %320 = tpu.matmul %279, %319, %cst_141 {dimension_numbers = #tpu.dot_dimension_numbers<[1], [0], [0], [1], [0, 0, 1, 1], [], []>} : vector<8x32xf32>, vector<32x128xf32>, vector<8x128xf32> -> vector<8x128xf32>
    %321 = arith.addf %318, %320 : vector<8x128xf32>
    %322 = vector.extract_strided_slice %321 {offsets = [0, 0], sizes = [8, 96], strides = [1, 1]} : vector<8x128xf32> to vector<8x96xf32>
    %cst_142 = arith.constant 5.000000e-01 : f32
    %323 = vector.broadcast %cst_142 : f32 to vector<8x96xf32>
    %324 = arith.mulf %323, %322 : vector<8x96xf32>
    %325 = math.tanh %324 : vector<8x96xf32>
    %cst_143 = arith.constant 1.000000e+00 : f32
    %326 = vector.broadcast %cst_143 : f32 to vector<8x96xf32>
    %327 = arith.addf %326, %325 : vector<8x96xf32>
    %cst_144 = arith.constant 5.000000e-01 : f32
    %328 = vector.broadcast %cst_144 : f32 to vector<8x96xf32>
    %329 = arith.mulf %328, %327 : vector<8x96xf32>
    %330 = vector.extract_strided_slice %321 {offsets = [0, 96], sizes = [8, 32], strides = [1, 1]} : vector<8x128xf32> to vector<8x32xf32>
    %331 = math.tanh %330 : vector<8x32xf32>
    %332 = vector.extract_strided_slice %329 {offsets = [0, 0], sizes = [8, 32], strides = [1, 1]} : vector<8x96xf32> to vector<8x32xf32>
    %333 = vector.extract_strided_slice %329 {offsets = [0, 32], sizes = [8, 32], strides = [1, 1]} : vector<8x96xf32> to vector<8x32xf32>
    %334 = vector.extract_strided_slice %329 {offsets = [0, 64], sizes = [8, 32], strides = [1, 1]} : vector<8x96xf32> to vector<8x32xf32>
    %335 = arith.mulf %333, %277 : vector<8x32xf32>
    %336 = arith.mulf %332, %331 : vector<8x32xf32>
    %337 = arith.addf %335, %336 : vector<8x32xf32>
    %338 = math.tanh %337 : vector<8x32xf32>
    %339 = arith.mulf %334, %338 : vector<8x32xf32>
    %c0_145 = arith.constant 0 : index
    %c0_146 = arith.constant 0 : index
    %340 = vector.load %arg8[%c0_145, %c0_146] : memref<32x256xf32, #tpu.memory_space<vmem>>, vector<32x256xf32>
    %cst_147 = arith.constant dense<0.000000e+00> : vector<8x256xf32>
    %341 = tpu.matmul %339, %340, %cst_147 {dimension_numbers = #tpu.dot_dimension_numbers<[1], [0], [0], [1], [0, 0, 1, 1], [], []>} : vector<8x32xf32>, vector<32x256xf32>, vector<8x256xf32> -> vector<8x256xf32>
    %342 = arith.addf %341, %309 : vector<8x256xf32>
    %343 = vector.extract_strided_slice %342 {offsets = [0, 0], sizes = [8, 192], strides = [1, 1]} : vector<8x256xf32> to vector<8x192xf32>
    %cst_148 = arith.constant 5.000000e-01 : f32
    %344 = vector.broadcast %cst_148 : f32 to vector<8x192xf32>
    %345 = arith.mulf %344, %343 : vector<8x192xf32>
    %346 = math.tanh %345 : vector<8x192xf32>
    %cst_149 = arith.constant 1.000000e+00 : f32
    %347 = vector.broadcast %cst_149 : f32 to vector<8x192xf32>
    %348 = arith.addf %347, %346 : vector<8x192xf32>
    %cst_150 = arith.constant 5.000000e-01 : f32
    %349 = vector.broadcast %cst_150 : f32 to vector<8x192xf32>
    %350 = arith.mulf %349, %348 : vector<8x192xf32>
    %351 = vector.extract_strided_slice %342 {offsets = [0, 192], sizes = [8, 64], strides = [1, 1]} : vector<8x256xf32> to vector<8x64xf32>
    %352 = math.tanh %351 : vector<8x64xf32>
    %353 = vector.extract_strided_slice %350 {offsets = [0, 0], sizes = [8, 64], strides = [1, 1]} : vector<8x192xf32> to vector<8x64xf32>
    %354 = vector.extract_strided_slice %350 {offsets = [0, 64], sizes = [8, 64], strides = [1, 1]} : vector<8x192xf32> to vector<8x64xf32>
    %355 = vector.extract_strided_slice %350 {offsets = [0, 128], sizes = [8, 64], strides = [1, 1]} : vector<8x192xf32> to vector<8x64xf32>
    %356 = arith.mulf %354, %298 : vector<8x64xf32>
    %357 = arith.mulf %353, %352 : vector<8x64xf32>
    %358 = arith.addf %356, %357 : vector<8x64xf32>
    %359 = math.tanh %358 : vector<8x64xf32>
    %360 = arith.mulf %355, %359 : vector<8x64xf32>
    %c5_151 = arith.constant 5 : index
    %361 = memref.load %arg12[%c5_151] : memref<8xf32, #tpu.memory_space<smem>>
    %362 = vector.broadcast %361 : f32 to vector<8x64xf32>
    %363 = arith.mulf %360, %362 : vector<8x64xf32>
    %364 = arith.addf %304, %363 : vector<8x64xf32>
    %c0_152 = arith.constant 0 : index
    %c0_153 = arith.constant 0 : index
    %365 = vector.load %arg9[%c0_152, %c0_153] : memref<64x256xf32, #tpu.memory_space<vmem>>, vector<64x256xf32>
    %cst_154 = arith.constant dense<0.000000e+00> : vector<8x256xf32>
    %366 = tpu.matmul %360, %365, %cst_154 {dimension_numbers = #tpu.dot_dimension_numbers<[1], [0], [0], [1], [0, 0, 1, 1], [], []>} : vector<8x64xf32>, vector<64x256xf32>, vector<8x256xf32> -> vector<8x256xf32>
    %c0_155 = arith.constant 0 : index
    %c0_156 = arith.constant 0 : index
    %367 = vector.load %arg10[%c0_155, %c0_156] : memref<1x256xf32, #tpu.memory_space<vmem>>, vector<1x256xf32>
    %368 = vector.broadcast %367 : vector<1x256xf32> to vector<8x256xf32>
    %369 = arith.addf %366, %368 : vector<8x256xf32>
    %c6 = arith.constant 6 : index
    %c0_157 = arith.constant 0 : index
    %c0_158 = arith.constant 0 : index
    %370 = vector.load %arg0[%c6, %c0_157, %c0_158] : memref<8x8x1xf32, #tpu.memory_space<vmem>>, vector<1x8x1xf32>
    %371 = vector.shape_cast %370 : vector<1x8x1xf32> to vector<8x1xf32>
    %c0_159 = arith.constant 0 : index
    %c0_160 = arith.constant 0 : index
    %372 = vector.load %arg5[%c0_159, %c0_160] : memref<1x128xf32, #tpu.memory_space<vmem>>, vector<1x128xf32>
    %373 = vector.broadcast %371 : vector<8x1xf32> to vector<8x128xf32>
    %374 = vector.broadcast %372 : vector<1x128xf32> to vector<8x128xf32>
    %375 = arith.mulf %373, %374 : vector<8x128xf32>
    %c0_161 = arith.constant 0 : index
    %c0_162 = arith.constant 0 : index
    %376 = vector.load %arg7[%c0_161, %c0_162] : memref<1x128xf32, #tpu.memory_space<vmem>>, vector<1x128xf32>
    %377 = vector.broadcast %376 : vector<1x128xf32> to vector<8x128xf32>
    %378 = arith.addf %375, %377 : vector<8x128xf32>
    %c0_163 = arith.constant 0 : index
    %c0_164 = arith.constant 0 : index
    %379 = vector.load %arg6[%c0_163, %c0_164] : memref<32x128xf32, #tpu.memory_space<vmem>>, vector<32x128xf32>
    %cst_165 = arith.constant dense<0.000000e+00> : vector<8x128xf32>
    %380 = tpu.matmul %339, %379, %cst_165 {dimension_numbers = #tpu.dot_dimension_numbers<[1], [0], [0], [1], [0, 0, 1, 1], [], []>} : vector<8x32xf32>, vector<32x128xf32>, vector<8x128xf32> -> vector<8x128xf32>
    %381 = arith.addf %378, %380 : vector<8x128xf32>
    %382 = vector.extract_strided_slice %381 {offsets = [0, 0], sizes = [8, 96], strides = [1, 1]} : vector<8x128xf32> to vector<8x96xf32>
    %cst_166 = arith.constant 5.000000e-01 : f32
    %383 = vector.broadcast %cst_166 : f32 to vector<8x96xf32>
    %384 = arith.mulf %383, %382 : vector<8x96xf32>
    %385 = math.tanh %384 : vector<8x96xf32>
    %cst_167 = arith.constant 1.000000e+00 : f32
    %386 = vector.broadcast %cst_167 : f32 to vector<8x96xf32>
    %387 = arith.addf %386, %385 : vector<8x96xf32>
    %cst_168 = arith.constant 5.000000e-01 : f32
    %388 = vector.broadcast %cst_168 : f32 to vector<8x96xf32>
    %389 = arith.mulf %388, %387 : vector<8x96xf32>
    %390 = vector.extract_strided_slice %381 {offsets = [0, 96], sizes = [8, 32], strides = [1, 1]} : vector<8x128xf32> to vector<8x32xf32>
    %391 = math.tanh %390 : vector<8x32xf32>
    %392 = vector.extract_strided_slice %389 {offsets = [0, 0], sizes = [8, 32], strides = [1, 1]} : vector<8x96xf32> to vector<8x32xf32>
    %393 = vector.extract_strided_slice %389 {offsets = [0, 32], sizes = [8, 32], strides = [1, 1]} : vector<8x96xf32> to vector<8x32xf32>
    %394 = vector.extract_strided_slice %389 {offsets = [0, 64], sizes = [8, 32], strides = [1, 1]} : vector<8x96xf32> to vector<8x32xf32>
    %395 = arith.mulf %393, %337 : vector<8x32xf32>
    %396 = arith.mulf %392, %391 : vector<8x32xf32>
    %397 = arith.addf %395, %396 : vector<8x32xf32>
    %398 = math.tanh %397 : vector<8x32xf32>
    %399 = arith.mulf %394, %398 : vector<8x32xf32>
    %c0_169 = arith.constant 0 : index
    %c0_170 = arith.constant 0 : index
    %400 = vector.load %arg8[%c0_169, %c0_170] : memref<32x256xf32, #tpu.memory_space<vmem>>, vector<32x256xf32>
    %cst_171 = arith.constant dense<0.000000e+00> : vector<8x256xf32>
    %401 = tpu.matmul %399, %400, %cst_171 {dimension_numbers = #tpu.dot_dimension_numbers<[1], [0], [0], [1], [0, 0, 1, 1], [], []>} : vector<8x32xf32>, vector<32x256xf32>, vector<8x256xf32> -> vector<8x256xf32>
    %402 = arith.addf %401, %369 : vector<8x256xf32>
    %403 = vector.extract_strided_slice %402 {offsets = [0, 0], sizes = [8, 192], strides = [1, 1]} : vector<8x256xf32> to vector<8x192xf32>
    %cst_172 = arith.constant 5.000000e-01 : f32
    %404 = vector.broadcast %cst_172 : f32 to vector<8x192xf32>
    %405 = arith.mulf %404, %403 : vector<8x192xf32>
    %406 = math.tanh %405 : vector<8x192xf32>
    %cst_173 = arith.constant 1.000000e+00 : f32
    %407 = vector.broadcast %cst_173 : f32 to vector<8x192xf32>
    %408 = arith.addf %407, %406 : vector<8x192xf32>
    %cst_174 = arith.constant 5.000000e-01 : f32
    %409 = vector.broadcast %cst_174 : f32 to vector<8x192xf32>
    %410 = arith.mulf %409, %408 : vector<8x192xf32>
    %411 = vector.extract_strided_slice %402 {offsets = [0, 192], sizes = [8, 64], strides = [1, 1]} : vector<8x256xf32> to vector<8x64xf32>
    %412 = math.tanh %411 : vector<8x64xf32>
    %413 = vector.extract_strided_slice %410 {offsets = [0, 0], sizes = [8, 64], strides = [1, 1]} : vector<8x192xf32> to vector<8x64xf32>
    %414 = vector.extract_strided_slice %410 {offsets = [0, 64], sizes = [8, 64], strides = [1, 1]} : vector<8x192xf32> to vector<8x64xf32>
    %415 = vector.extract_strided_slice %410 {offsets = [0, 128], sizes = [8, 64], strides = [1, 1]} : vector<8x192xf32> to vector<8x64xf32>
    %416 = arith.mulf %414, %358 : vector<8x64xf32>
    %417 = arith.mulf %413, %412 : vector<8x64xf32>
    %418 = arith.addf %416, %417 : vector<8x64xf32>
    %419 = math.tanh %418 : vector<8x64xf32>
    %420 = arith.mulf %415, %419 : vector<8x64xf32>
    %c6_175 = arith.constant 6 : index
    %421 = memref.load %arg12[%c6_175] : memref<8xf32, #tpu.memory_space<smem>>
    %422 = vector.broadcast %421 : f32 to vector<8x64xf32>
    %423 = arith.mulf %420, %422 : vector<8x64xf32>
    %424 = arith.addf %364, %423 : vector<8x64xf32>
    %c0_176 = arith.constant 0 : index
    %c0_177 = arith.constant 0 : index
    %425 = vector.load %arg9[%c0_176, %c0_177] : memref<64x256xf32, #tpu.memory_space<vmem>>, vector<64x256xf32>
    %cst_178 = arith.constant dense<0.000000e+00> : vector<8x256xf32>
    %426 = tpu.matmul %420, %425, %cst_178 {dimension_numbers = #tpu.dot_dimension_numbers<[1], [0], [0], [1], [0, 0, 1, 1], [], []>} : vector<8x64xf32>, vector<64x256xf32>, vector<8x256xf32> -> vector<8x256xf32>
    %c0_179 = arith.constant 0 : index
    %c0_180 = arith.constant 0 : index
    %427 = vector.load %arg10[%c0_179, %c0_180] : memref<1x256xf32, #tpu.memory_space<vmem>>, vector<1x256xf32>
    %428 = vector.broadcast %427 : vector<1x256xf32> to vector<8x256xf32>
    %429 = arith.addf %426, %428 : vector<8x256xf32>
    %c7 = arith.constant 7 : index
    %c0_181 = arith.constant 0 : index
    %c0_182 = arith.constant 0 : index
    %430 = vector.load %arg0[%c7, %c0_181, %c0_182] : memref<8x8x1xf32, #tpu.memory_space<vmem>>, vector<1x8x1xf32>
    %431 = vector.shape_cast %430 : vector<1x8x1xf32> to vector<8x1xf32>
    %c0_183 = arith.constant 0 : index
    %c0_184 = arith.constant 0 : index
    %432 = vector.load %arg5[%c0_183, %c0_184] : memref<1x128xf32, #tpu.memory_space<vmem>>, vector<1x128xf32>
    %433 = vector.broadcast %431 : vector<8x1xf32> to vector<8x128xf32>
    %434 = vector.broadcast %432 : vector<1x128xf32> to vector<8x128xf32>
    %435 = arith.mulf %433, %434 : vector<8x128xf32>
    %c0_185 = arith.constant 0 : index
    %c0_186 = arith.constant 0 : index
    %436 = vector.load %arg7[%c0_185, %c0_186] : memref<1x128xf32, #tpu.memory_space<vmem>>, vector<1x128xf32>
    %437 = vector.broadcast %436 : vector<1x128xf32> to vector<8x128xf32>
    %438 = arith.addf %435, %437 : vector<8x128xf32>
    %c0_187 = arith.constant 0 : index
    %c0_188 = arith.constant 0 : index
    %439 = vector.load %arg6[%c0_187, %c0_188] : memref<32x128xf32, #tpu.memory_space<vmem>>, vector<32x128xf32>
    %cst_189 = arith.constant dense<0.000000e+00> : vector<8x128xf32>
    %440 = tpu.matmul %399, %439, %cst_189 {dimension_numbers = #tpu.dot_dimension_numbers<[1], [0], [0], [1], [0, 0, 1, 1], [], []>} : vector<8x32xf32>, vector<32x128xf32>, vector<8x128xf32> -> vector<8x128xf32>
    %441 = arith.addf %438, %440 : vector<8x128xf32>
    %442 = vector.extract_strided_slice %441 {offsets = [0, 0], sizes = [8, 96], strides = [1, 1]} : vector<8x128xf32> to vector<8x96xf32>
    %cst_190 = arith.constant 5.000000e-01 : f32
    %443 = vector.broadcast %cst_190 : f32 to vector<8x96xf32>
    %444 = arith.mulf %443, %442 : vector<8x96xf32>
    %445 = math.tanh %444 : vector<8x96xf32>
    %cst_191 = arith.constant 1.000000e+00 : f32
    %446 = vector.broadcast %cst_191 : f32 to vector<8x96xf32>
    %447 = arith.addf %446, %445 : vector<8x96xf32>
    %cst_192 = arith.constant 5.000000e-01 : f32
    %448 = vector.broadcast %cst_192 : f32 to vector<8x96xf32>
    %449 = arith.mulf %448, %447 : vector<8x96xf32>
    %450 = vector.extract_strided_slice %441 {offsets = [0, 96], sizes = [8, 32], strides = [1, 1]} : vector<8x128xf32> to vector<8x32xf32>
    %451 = math.tanh %450 : vector<8x32xf32>
    %452 = vector.extract_strided_slice %449 {offsets = [0, 0], sizes = [8, 32], strides = [1, 1]} : vector<8x96xf32> to vector<8x32xf32>
    %453 = vector.extract_strided_slice %449 {offsets = [0, 32], sizes = [8, 32], strides = [1, 1]} : vector<8x96xf32> to vector<8x32xf32>
    %454 = vector.extract_strided_slice %449 {offsets = [0, 64], sizes = [8, 32], strides = [1, 1]} : vector<8x96xf32> to vector<8x32xf32>
    %455 = arith.mulf %453, %397 : vector<8x32xf32>
    %456 = arith.mulf %452, %451 : vector<8x32xf32>
    %457 = arith.addf %455, %456 : vector<8x32xf32>
    %458 = math.tanh %457 : vector<8x32xf32>
    %459 = arith.mulf %454, %458 : vector<8x32xf32>
    %c0_193 = arith.constant 0 : index
    %c0_194 = arith.constant 0 : index
    %460 = vector.load %arg8[%c0_193, %c0_194] : memref<32x256xf32, #tpu.memory_space<vmem>>, vector<32x256xf32>
    %cst_195 = arith.constant dense<0.000000e+00> : vector<8x256xf32>
    %461 = tpu.matmul %459, %460, %cst_195 {dimension_numbers = #tpu.dot_dimension_numbers<[1], [0], [0], [1], [0, 0, 1, 1], [], []>} : vector<8x32xf32>, vector<32x256xf32>, vector<8x256xf32> -> vector<8x256xf32>
    %462 = arith.addf %461, %429 : vector<8x256xf32>
    %463 = vector.extract_strided_slice %462 {offsets = [0, 0], sizes = [8, 192], strides = [1, 1]} : vector<8x256xf32> to vector<8x192xf32>
    %cst_196 = arith.constant 5.000000e-01 : f32
    %464 = vector.broadcast %cst_196 : f32 to vector<8x192xf32>
    %465 = arith.mulf %464, %463 : vector<8x192xf32>
    %466 = math.tanh %465 : vector<8x192xf32>
    %cst_197 = arith.constant 1.000000e+00 : f32
    %467 = vector.broadcast %cst_197 : f32 to vector<8x192xf32>
    %468 = arith.addf %467, %466 : vector<8x192xf32>
    %cst_198 = arith.constant 5.000000e-01 : f32
    %469 = vector.broadcast %cst_198 : f32 to vector<8x192xf32>
    %470 = arith.mulf %469, %468 : vector<8x192xf32>
    %471 = vector.extract_strided_slice %462 {offsets = [0, 192], sizes = [8, 64], strides = [1, 1]} : vector<8x256xf32> to vector<8x64xf32>
    %472 = math.tanh %471 : vector<8x64xf32>
    %473 = vector.extract_strided_slice %470 {offsets = [0, 0], sizes = [8, 64], strides = [1, 1]} : vector<8x192xf32> to vector<8x64xf32>
    %474 = vector.extract_strided_slice %470 {offsets = [0, 64], sizes = [8, 64], strides = [1, 1]} : vector<8x192xf32> to vector<8x64xf32>
    %475 = vector.extract_strided_slice %470 {offsets = [0, 128], sizes = [8, 64], strides = [1, 1]} : vector<8x192xf32> to vector<8x64xf32>
    %476 = arith.mulf %474, %418 : vector<8x64xf32>
    %477 = arith.mulf %473, %472 : vector<8x64xf32>
    %478 = arith.addf %476, %477 : vector<8x64xf32>
    %479 = math.tanh %478 : vector<8x64xf32>
    %480 = arith.mulf %475, %479 : vector<8x64xf32>
    %c7_199 = arith.constant 7 : index
    %481 = memref.load %arg12[%c7_199] : memref<8xf32, #tpu.memory_space<smem>>
    %482 = vector.broadcast %481 : f32 to vector<8x64xf32>
    %483 = arith.mulf %480, %482 : vector<8x64xf32>
    %484 = arith.addf %424, %483 : vector<8x64xf32>
    %c0_200 = arith.constant 0 : index
    %c0_201 = arith.constant 0 : index
    %485 = vector.load %arg11[%c0_200, %c0_201] : memref<64x1xf32, #tpu.memory_space<vmem>>, vector<64x1xf32>
    %cst_202 = arith.constant dense<0.000000e+00> : vector<8x1xf32>
    %486 = tpu.matmul %484, %485, %cst_202 {dimension_numbers = #tpu.dot_dimension_numbers<[1], [0], [0], [1], [0, 0, 1, 1], [], []>} : vector<8x64xf32>, vector<64x1xf32>, vector<8x1xf32> -> vector<8x1xf32>
    %c0_203 = arith.constant 0 : index
    %487 = memref.load %arg13[%c0_203] : memref<1xf32, #tpu.memory_space<smem>>
    %488 = vector.broadcast %487 : f32 to vector<8x1xf32>
    %489 = arith.addf %486, %488 : vector<8x1xf32>
    %c0_204 = arith.constant 0 : index
    %c0_205 = arith.constant 0 : index
    %490 = vector.load %arg14[%c0_204, %c0_205] : memref<8x1xf32, #tpu.memory_space<vmem>>, vector<8x1xf32>
    tpu.vector_store %arg14[%c0_204, %c0_205], %489 {strides = array<i32>} : memref<8x1xf32, #tpu.memory_space<vmem>>, vector<8x1xf32>,
    return
  }
}

</mosaic_0001>

<bundles_post_ra>
// kernel: tpu_custom_call.1
= control target key start
LH: loop header
LB: loop body
LE: loop exit
PB: predicated region body
PF: predicated region fallthrough
CT: control target
= control target key end

     0   :  { %20 = vsyncpa [#allocation4], 0  ;;  %s2716_s0 = inlined_call_operand.vmem [shape: f32[8,8,1], index: 0, kind: input, shape index: {}]   ;;  %s2717_s1 = inlined_call_operand.vmem [shape: f32[8,32], index: 1, kind: input, shape index: {}]   ;;  %s2718_s2 = inlined_call_operand.vmem [shape: f32[8,32], index: 2, kind: input, shape index: {}]   ;;  %s2719_s3 = inlined_call_operand.hbm [shape: f32[8,64], index: 3, kind: input, shape index: {}]   ;;  %s2720_s4 = inlined_call_operand.hbm [shape: f32[8,64], index: 4, kind: input, shape index: {}]   ;;  %s2721_s5 = inlined_call_operand.vmem [shape: f32[1,128], index: 5, kind: input, shape index: {}]   ;;  %s2722_s6 = inlined_call_operand.hbm [shape: f32[32,128], index: 6, kind: input, shape index: {}]   ;;  %s2723_s7 = inlined_call_operand.hbm [shape: f32[1,128], index: 7, kind: input, shape index: {}]   ;;  %s2724_s8 = inlined_call_operand.hbm [shape: f32[32,256], index: 8, kind: input, shape index: {}]   ;;  %s2725_s9 = inlined_call_operand.vmem [shape: f32[64,256], index: 9, kind: input, shape index: {}]   ;;  %s2726_s10 = inlined_call_operand.vmem [shape: f32[1,256], index: 10, kind: input, shape index: {}]   ;;  %s2727_s11 = inlined_call_operand.vmem [shape: f32[64,1], index: 11, kind: input, shape index: {}]   ;;  %s2728_s12 = inlined_call_operand.vmem [shape: f32[8], index: 12, kind: input, shape index: {}]   ;;  %s2729_s13 = inlined_call_operand.<no memory space> [shape: f32[1], index: 13, kind: input, shape index: {}]   ;;  %s2730_s14 = inlined_call_operand.vmem [shape: f32[8,1], index: 14, kind: output, shape index: {}]  }
   0x1   :  { %21 = vsyncpa [#allocation7], 0 }
   0x2   :  { %22 = vsyncpa [#allocation10], 0  ;;  %s46_s15 = sshll.u32 %s2720_s4, 4  ;;  %s47_s15 = int_to_ptr.hbm [resolvable:$true] %s46_s15 }
   0x3   :  { %23 = vsyncpa [#allocation5], 0  ;;  %s1949_s16 = smov [#allocation6]   ;;  %s72_s20 = sshll.u32 %s2723_s7, 4  ;;  %s73_s20 = int_to_ptr.hbm [resolvable:$true] %s72_s20 }
   0x4   :  { %s48_s17 = sshll.u32 %s1949_s16, 4  ;;  %s1950_s21 = smov [#allocation9]   ;;  %s49_s17 = int_to_ptr.vmem [resolvable:$true] %s48_s17 }
   0x5   :  { %51 = dma.hbm_to_vmem [thread:$0]  %s47_s15, 128, %s49_s17, [#allocation7]  }
   0x6   :  { %s74_s22 = sshll.u32 %s1950_s21, 4  ;;  %s35_s25 = sshll.u32 %s2719_s3, 4  ;;  %s75_s22 = int_to_ptr.vmem [resolvable:$true] %s74_s22  ;;  %s36_s25 = int_to_ptr.hbm [resolvable:$true] %s35_s25 }
   0x7   :  { %77 = dma.hbm_to_vmem [thread:$0]  %s73_s20, 16, %s75_s22, [#allocation10]  }
   0x8   :  { %s58_s27 = sshll.u32 %s2722_s6, 4  ;;  %s1951_s28 = smov [#allocation3]   ;;  %s59_s27 = int_to_ptr.hbm [resolvable:$true] %s58_s27 }
   0x9   :  { %s37_s29 = sshll.u32 %s1951_s28, 4  ;;  %s1952_s7 = smov [#allocation8]   ;;  %s38_s29 = int_to_ptr.vmem [resolvable:$true] %s37_s29 }
   0xa   :  { %40 = dma.hbm_to_vmem [thread:$0]  %s36_s25, 128, %s38_s29, [#allocation4]  }
   0xb   :  { %s60_s30 = sshll.u32 %s1952_s7, 4  ;;  %s1953_s15 = smov 128   ;;  %s61_s30 = int_to_ptr.vmem [resolvable:$true] %s60_s30 }
   0xc   :  { %s1954_s16 = smov 8   ;;  %s82_s18 = sshll.u32 %s2724_s8, 4  ;;  %s83_s18 = int_to_ptr.hbm [resolvable:$true] %s82_s18 }
   0xd   :  { %66 = dma.hbm_to_vmem [thread:$0]  %s59_s27, 512, %s61_s30, [#allocation7], %s1953_s15, %s1953_s15, %s1954_s16  }
   0xe   :  { %s1955_s19 = smov [#allocation11]   ;;  %s102_s22 = sshll.u32 %s2728_s12, 4  ;;  %s103_s22 = int_to_ptr.vmem [resolvable:$true] %s102_s22 }
   0xf   :  { %s84_s20 = sshll.u32 %s1955_s19, 4  ;;  %s1956_s23 = smov 256   ;;  %s85_s20 = int_to_ptr.vmem [resolvable:$true] %s84_s20 }
  0x10   :  { %s1957_s24 = smov 16   ;;  %s1958_s25 = smov [#allocation12]  }
  0x11   :  { %90 = dma.hbm_to_vmem [thread:$0]  %s83_s18, 1024, %s85_s20, [#allocation10], %s1956_s23, %s1956_s23, %s1957_s24  }
  0x12   :  { %105 = dma.vmem_to_smem %s103_s22, 16, %s1958_s25, [#allocation5]  }
  0x13   :  { %1941 = dma.done.wait [#allocation4], 128  }
  0x14   :  { %1942 = vsyncadd [#allocation4], 4294967168 }
  0x15   :  { %1943 = dma.done.wait [#allocation7], 640  }
  0x16   :  { %1944 = vsyncadd [#allocation7], 4294966656 }
  0x17   :  { %1945 = dma.done.wait [#allocation10], 1040  }
  0x18   :  { %1946 = vsyncadd [#allocation10], 4294966256 }
  0x19   :  { %1947 = dma.done.wait [#allocation5], 16  }
  0x1a   :  { %1948 = vsyncadd [#allocation5], 4294967280 }
  0x1b   :  { %132 = sfence }
  0x1c   :  { %v2055_v0 = vld [vmem:[#allocation8 + $0x18] sm:$0xff]  ;;  %v2057_v1 = vld [vmem:[#allocation8 + $0x10] sm:$0xff]  ;;  %v1959_v2 = vmov 0   ;;  %v2063_v4 = vld [vmem:[#allocation8 + $0x8] sm:$0xff]  ;;  %s1960_s27 = smov 32   ;;  %vm223_vm0 = vcmask 261120  }
  0x1d   :  { %239 = vmatpush.msra.mxu2 %v2055_v0  ;;  %1662 = vset.pattern.permute.xlu0 %v1959_v2  ;;  %v203_v3 = vld [vmem:[%s2716_s0] sm:$0xff]  ;;  %v2070_v6 = vld [vmem:[#allocation8] sm:$0xff]  ;;  %v1601_v16 = vld [vmem:[%s2716_s0 + $0x8] sm:$0xff]  ;;  %vm159_vm1 = vcmask 523264   ;;  %s1961_s19 = smov 64   ;;  %s357_s8 = sld [smem:[#allocation12]] }
  0x1e   :  { %207 = vperm.xlu0 %1662, %v203_v3   ;;  %v134_v5 = vld [vmem:[%s2718_s2] sm:$0xff]  ;;  %1663 = vset.pattern.permute.xlu2 %v1959_v2  ;;  %v2084_v11 = vld [vmem:[#allocation9] ss:$0 sm:$0xff]  ;;  %v2103_v28 = vld [vmem:[%s2725_s9 + $0x78] sm:$0xff]  ;;  %s1605_s12 = sld [smem:[#allocation12 + $0x1]]  ;;  %vm1584_vm2 = vcmask 7168  }
  0x1f   :  { %240 = vmatpush.msra.mxu2 %v2057_v1  ;;  %254 = vrot.lane.b32.xlu1 %v134_v5, %s1960_s27  ;;  %v133_v7 = vld [vmem:[%s2717_s1] sm:$0xff]  ;;  %v2108_v29 = vld [vmem:[%s2725_s9 + $0x68] sm:$0xff]  ;;  %v2114_v30 = vld [vmem:[%s2725_s9 + $0x58] sm:$0xff]  ;;  %s1612_s28 = sld [smem:[#allocation12 + $0x2]] }
  0x20   :  { %1664 = vset.pattern.permute.xlu1 %v1959_v2  ;;  %v2081_v8 = vld [vmem:[%s2721_s5] ss:$0 sm:$0xff]  ;;  %191 = vmatpush.msra.mxu1 %v2103_v28  ;;  %v2119_v31 = vld [vmem:[%s2725_s9 + $0x70] sm:$0xff]  ;;  %v2130_v33 = vld [vmem:[%s2725_s9 + $0x48] sm:$0xff]  ;;  %s1619_s30 = sld [smem:[#allocation12 + $0x3]] }
  0x21   :  { %241 = vmatpush.msra.mxu2 %v2063_v4  ;;  %v2124_v32 = vld [vmem:[%s2725_s9 + $0x60] sm:$0xff]  ;;  %171 = vmatpush.msra.mxu0 %v2119_v31  ;;  %v2136_v34 = vld [vmem:[%s2725_s9 + $0x50] sm:$0xff]  ;;  %v2151_v39 = vld [vmem:[%s2725_s9 + $0x38] sm:$0xff]  ;;  %s1626_s3 = sld [smem:[#allocation12 + $0x4]] }
  0x22   :  { %192 = vmatpush.msra.mxu1 %v2108_v29  ;;  %v2138_v35 = vld [vmem:[#allocation11 + $0x30] sm:$0xff]  ;;  %v2140_v36 = vld [vmem:[#allocation11 + $0x38] sm:$0xff]  ;;  %v2144_v37 = vld [vmem:[#allocation11 + $0x20] sm:$0xff]  ;;  %s1647_s20 = sld [smem:[#allocation12 + $0x7]] }
  0x23   :  { %242 = vmatpush.msra.mxu2 %v2070_v6  ;;  %172 = vmatpush.msra.mxu0 %v2124_v32  ;;  %v2146_v38 = vld [vmem:[#allocation11 + $0x28] sm:$0xff]  ;;  %v2162_v41 = vld [vmem:[#allocation11 + $0x10] sm:$0xff]  ;;  %v2164_v42 = vld [vmem:[#allocation11 + $0x18] sm:$0xff] }
  0x24   :  { %1596 = vmatmul.msk.f32.vlgmr.msra.gmra.mxu2 %vm223_vm0, %v133_v7  ;;  %193 = vmatpush.msra.mxu1 %v2114_v30  ;;  %v2158_v40 = vld [vmem:[%s2725_s9 + $0x40] sm:$0xff]  ;;  %v2169_v43 = vld [vmem:[%s2725_s9 + $0x28] sm:$0xff]  ;;  %v2176_v44 = vld [vmem:[%s2725_s9 + $0x30] sm:$0xff] }
  0x25   :  { %299 = vmatpush.msra.mxu3 %v2138_v35  ;;  %319 = vmatpush.msrb.mxu2 %v2140_v36  ;;  %v2180_v45 = vld [vmem:[#allocation11] sm:$0xff]  ;;  %v2182_v46 = vld [vmem:[#allocation11 + $0x8] sm:$0xff]  ;;  %v2201_v49 = vld [vmem:[%s2725_s9 + $0x8] sm:$0xff] }
  0x26   :  { %194 = vmatpush.msra.mxu1 %v2130_v33  ;;  %173 = vmatpush.msra.mxu0 %v2136_v34  ;;  %v2187_v47 = vld [vmem:[%s2725_s9 + $0x18] sm:$0xff]  ;;  %v2194_v48 = vld [vmem:[%s2725_s9 + $0x20] sm:$0xff]  ;;  %v2232_v53 = vld [vmem:[%s2725_s9 + $0x10] sm:$0xff] }
  0x27   :  { %300 = vmatpush.msra.mxu3 %v2144_v37  ;;  %320 = vmatpush.msrb.mxu2 %v2146_v38  ;;  %v135_v50 = vld [vmem:[#allocation3] sm:$0xff] }
  0x28   :  { %195 = vmatpush.msra.mxu1 %v2151_v39  ;;  %174 = vmatpush.msra.mxu0 %v2158_v40  ;;  %v2237_v54 = vld [vmem:[%s2725_s9] sm:$0xff] }
  0x29   :  { %301 = vmatpush.msra.mxu3 %v2162_v41  ;;  %321 = vmatpush.msrb.mxu2 %v2164_v42  ;;  %v153_v59 = vld [vmem:[%s2726_s10] sm:$0x3] }
  0x2a   :  { %196 = vmatpush.msra.mxu1 %v2169_v43  ;;  %175 = vmatpush.msra.mxu0 %v2176_v44  ;;  %v2284_v61 = vperm.slane %v153_v59, 1 }
  0x2b   :  { %302 = vmatpush.msra.mxu3 %v2180_v45  ;;  %322 = vmatpush.msrb.mxu2 %v2182_v46 }
  0x2c   :  { %197 = vmatpush.msra.mxu1 %v2187_v47  ;;  %176 = vmatpush.msra.mxu0 %v2194_v48 }
  0x2d   :  { %372 = vmatpush.msrb.mxu3 %v2119_v31  ;;  %473 = vmatpush.msra.mxu2 %v2138_v35 }
  0x2e   :  { %198 = vmatpush.msra.mxu1 %v2201_v49  ;;  %177 = vmatpush.msra.mxu0 %v2232_v53 }
  0x2f   :  { %1595 = vmatmul.msk.f32.vlgmr.msra.gmra.mxu1 %vm159_vm1, %v135_v50  ;;  %373 = vmatpush.msrb.mxu3 %v2124_v32 }
  0x30   :  { %425 = vmatpush.msrb.mxu1 %v2055_v0  ;;  %474 = vmatpush.msra.mxu2 %v2144_v37 }
  0x31   :  { %374 = vmatpush.msrb.mxu3 %v2136_v34  ;;  %178 = vmatpush.msra.mxu0 %v2237_v54 }
  0x32   :  { %426 = vmatpush.msrb.mxu1 %v2057_v1  ;;  %475 = vmatpush.msra.mxu2 %v2162_v41 }
  0x33   :  { %375 = vmatpush.msrb.mxu3 %v2158_v40  ;;  %1594 = vmatmul.msk.f32.vlgmr.msra.gmra.mxu0 %vm159_vm1, %v135_v50 }
  0x34   :  { %427 = vmatpush.msrb.mxu1 %v2063_v4  ;;  %476 = vmatpush.msra.mxu2 %v2180_v45 }
  0x35   :  { %376 = vmatpush.msrb.mxu3 %v2176_v44  ;;  %392 = vmatpush.msrb.mxu0 %v2103_v28 }
  0x36   :  { %428 = vmatpush.msrb.mxu1 %v2070_v6 }
  0x37   :  { %377 = vmatpush.msrb.mxu3 %v2194_v48  ;;  %393 = vmatpush.msrb.mxu0 %v2108_v29 }
  0x38   :  { %493 = vmatpush.msra.mxu1 %v2140_v36 }
  0x39   :  { %378 = vmatpush.msrb.mxu3 %v2232_v53  ;;  %394 = vmatpush.msrb.mxu0 %v2114_v30 }
  0x3a   :  { %494 = vmatpush.msra.mxu1 %v2146_v38 }
  0x3b   :  { %379 = vmatpush.msrb.mxu3 %v2237_v54  ;;  %395 = vmatpush.msrb.mxu0 %v2130_v33 }
  0x3c   :  { %495 = vmatpush.msra.mxu1 %v2164_v42 }
  0x3d   :  { %396 = vmatpush.msrb.mxu0 %v2151_v39 }
  0x3e   :  { %496 = vmatpush.msra.mxu1 %v2182_v46 }
  0x3f   :  { %397 = vmatpush.msrb.mxu0 %v2169_v43 }
  0x41   :  { %398 = vmatpush.msrb.mxu0 %v2187_v47 }
  0x43   :  { %399 = vmatpush.msrb.mxu0 %v2201_v49 }
  0x45   :  { %663 = vmatpush.msra.mxu0 %v2140_v36 }
  0x47   :  { %664 = vmatpush.msra.mxu0 %v2146_v38 }
  0x49   :  { %665 = vmatpush.msra.mxu0 %v2164_v42 }
  0x4b   :  { %666 = vmatpush.msra.mxu0 %v2182_v46 }
  0x90   :  { %v208_v9 = vpop.permute.xlu0 %207 }
  0x91   :  { %v213_v10 = vmul.f32 %v2081_v8, %v208_v9  ;;  %v255_v23 = vpop.permute.xlu1 %254 }
  0x93   :  { %v218_v12 = vadd.f32 %v2084_v11, %v213_v10  ;;  %v2289_v10 = vperm.slane %v153_v59, 0 }
  0xa7   :  { %v244_v13 = vpop.f32.mrf.mxu2 }
  0xa8   :  { %v247_v14 = vadd.f32 %v244_v13, %v218_v12 }
  0xaa   :  { %1667 = vtanh.f32 %v247_v14  ;;  %v248_v17 = vmul.f32 0.5, %v247_v14 }
  0xac   :  { %1669 = vtanh.f32 %v248_v17  ;;  %v200_v56 = vpop.f32.mrf.mxu1 }
  0xad   :  { %v201_v2 = vadd.f32 %v200_v56, %v2284_v61 }
  0xb0   :  { %v1668_v15 = vpop.eup %1667  ;;  %v180_v12 = vpop.f32.mrf.mxu0 }
  0xb1   :  { %259 = vrot.lane.b32.xlu0 %v1668_v15, %s1960_s27  ;;  %v181_v13 = vadd.f32 %v180_v12, %v2289_v10 }
  0xb2   :  { %v1670_v18 = vpop.eup %1669 }
  0xb3   :  { %v250_v19 = vadd.f32 1.0, %v1670_v18 }
  0xb5   :  { %v2091_v20 = vmul.f32 0.5, %v250_v19 }
  0xb7   :  { %v257_v24 = vmul.f32 %v255_v23, %v2091_v20 }
  0xb9   :  { %408 = vperm.xlu0 %1662, %v1601_v16  }
 0x123   :  { %v260_v21 = vpop.permute.xlu0 %259 }
 0x124   :  { %v262_v22 = vmul.f32 %v260_v21, %v2091_v20 }
 0x126   :  { %264 = vrot.lane.b32.xlu1 %v262_v22, %s1960_s27 }
 0x12b   :  { %v409_v57 = vpop.permute.xlu0 %408 }
 0x12c   :  { %v411_v58 = vmul.f32 %v2081_v8, %v409_v57 }
 0x12e   :  { %v412_v60 = vadd.f32 %v2084_v11, %v411_v58 }
 0x198   :  { %v265_v25 = vpop.permute.xlu1 %264 }
 0x199   :  { %v2096_v26 = vadd.f32 %v265_v25, %v257_v24 }
 0x19b   :  { %1671 = vtanh.f32 %v2096_v26 }
 0x1a1   :  { %v1672_v27 = vpop.eup %1671 }
 0x1a2   :  { %270 = vrot.lane.b32.xlu2 %v1672_v27, %s1960_s27 }
 0x1fc   :  { %v271_v51 = vpop.permute.xlu2 %270 }
 0x1fd   :  { %v273_v52 = vmul.f32 %v271_v51, %v2091_v20  ;;  %v136_v51 = vld [vmem:[#allocation6] sm:$0xff] }
 0x1ff   :  { %283 = vrot.lane.b32.xlu2 %v273_v52, %s1961_s19  ;;  %v1608_v52 = vld [vmem:[%s2716_s0 + $0x10] sm:$0xff] }
 0x259   :  { %v284_v55 = vpop.permute.xlu2 %283 }
 0x25a   :  { %1597 = vmatmul.msk.f32.vlgmr.msra.gmra.mxu3 %vm223_vm0, %v284_v55  ;;  %1598 = vmatmul.msk.f32.vlgmr.msrb.gmra.mxu2 %vm223_vm0, %v284_v55 }
 0x25b   :  { %1602 = vmatmul.msk.f32.vlgmr.msrb.gmra.mxu1 %vm223_vm0, %v284_v55  ;;  %542 = vmatpush.msrb.mxu2 %v2119_v31 }
 0x25c   :  { %595 = vmatpush.msrb.mxu1 %v2055_v0  ;;  %562 = vmatpush.msra.mxu3 %v2103_v28 }
 0x25d   :  { %543 = vmatpush.msrb.mxu2 %v2124_v32 }
 0x25e   :  { %596 = vmatpush.msrb.mxu1 %v2057_v1  ;;  %563 = vmatpush.msra.mxu3 %v2108_v29 }
 0x25f   :  { %544 = vmatpush.msrb.mxu2 %v2136_v34 }
 0x260   :  { %597 = vmatpush.msrb.mxu1 %v2063_v4  ;;  %564 = vmatpush.msra.mxu3 %v2114_v30 }
 0x261   :  { %545 = vmatpush.msrb.mxu2 %v2158_v40 }
 0x262   :  { %598 = vmatpush.msrb.mxu1 %v2070_v6  ;;  %565 = vmatpush.msra.mxu3 %v2130_v33 }
 0x263   :  { %546 = vmatpush.msrb.mxu2 %v2176_v44 }
 0x264   :  { %566 = vmatpush.msra.mxu3 %v2151_v39 }
 0x265   :  { %547 = vmatpush.msrb.mxu2 %v2194_v48 }
 0x266   :  { %567 = vmatpush.msra.mxu3 %v2169_v43 }
 0x267   :  { %548 = vmatpush.msrb.mxu2 %v2232_v53 }
 0x268   :  { %568 = vmatpush.msra.mxu3 %v2187_v47 }
 0x269   :  { %549 = vmatpush.msrb.mxu2 %v2237_v54 }
 0x26a   :  { %569 = vmatpush.msra.mxu3 %v2201_v49 }
 0x2d8   :  { %v430_v62 = vpop.f32.mrf.mxu1 }
 0x2d9   :  { %v433_v63 = vadd.f32 %v430_v62, %v412_v60 }
 0x2db   :  { %1673 = vtanh.f32 %v433_v63  ;;  %v434_v15 = vmul.f32 0.5, %v433_v63 }
 0x2dd   :  { %v324_v3 = vpop.f32.mrf.mxu2  ;;  %v304_v14 = vpop.f32.mrf.mxu3 }
 0x2de   :  { %v325_v5 = vadd.f32 %v324_v3, %v201_v2  ;;  %v305_v16 = vadd.f32 %v304_v14, %v181_v13 }
 0x2e0   :  { %1675 = vtanh.f32 %v325_v5  ;;  %v327_v17 = vmul.f32 0.5, %v305_v16  ;;  %v328_v3 = vmul.f32 0.5, %v325_v5 }
 0x2e1   :  { %v1674_v7 = vpop.eup %1673  ;;  %1677 = vtanh.f32 %v434_v15 }
 0x2e2   :  { %441 = vrot.lane.b32.xlu1 %v1674_v7, %s1960_s27  ;;  %1679 = vtanh.f32 %v327_v17 }
 0x2e6   :  { %v1676_v9 = vpop.eup %1675 }
 0x2e7   :  { %342 = vrot.lane.b32.xlu0 %v1676_v9, %s1961_s19  ;;  %v1678_v18 = vpop.eup %1677 }
 0x2e8   :  { %v436_v19 = vadd.f32 1.0, %v1678_v18  ;;  %v1680_v20 = vpop.eup %1679 }
 0x2e9   :  { %v331_v23 = vadd.f32 1.0, %v1680_v20 }
 0x2ea   :  { %v437_v21 = vmul.f32 0.5, %v436_v19 }
 0x2eb   :  { %v333_v25 = vmul.f32 0.5, %v331_v23 }
 0x2ec   :  { %v439_v55 = vmul.f32 %v437_v21, %v2096_v26 }
 0x354   :  { %v442_v22 = vpop.permute.xlu1 %441 }
 0x355   :  { %v444_v24 = vmul.f32 %v442_v22, %v437_v21 }
 0x357   :  { %446 = vrot.lane.b32.xlu2 %v444_v24, %s1960_s27 }
 0x359   :  { %v343_v27 = vpop.permute.xlu0 %342 }
 0x35a   :  { %v345_v50 = vmul.f32 %v343_v27, %v333_v25 }
 0x35c   :  { %347 = vrot.lane.b32.xlu0 %v345_v50, %s1961_s19 }
 0x35f   :  { %337 = vrot.lane.b32.xlu2 %v136_v51, %s1961_s19 }
 0x364   :  { %578 = vperm.xlu0 %1662, %v1608_v52  }
 0x3b1   :  { %v447_v56 = vpop.permute.xlu2 %446 }
 0x3b2   :  { %v2299_v57 = vadd.f32 %v447_v56, %v439_v55 }
 0x3b4   :  { %1681 = vtanh.f32 %v2299_v57 }
 0x3b9   :  { %v338_v59 = vpop.permute.xlu2 %337 }
 0x3ba   :  { %v1682_v58 = vpop.eup %1681  ;;  %v340_v60 = vmul.f32 %v338_v59, %v333_v25 }
 0x3bb   :  { %452 = vrot.lane.b32.xlu1 %v1682_v58, %s1960_s27 }
 0x3ce   :  { %v348_v62 = vpop.permute.xlu0 %347 }
 0x3cf   :  { %v2303_v63 = vadd.f32 %v348_v62, %v340_v60 }
 0x3d1   :  { %1683 = vtanh.f32 %v2303_v63 }
 0x3d2   :  { %1685 = vtanh.f32 %v328_v3 }
 0x3d6   :  { %v579_v18 = vpop.permute.xlu0 %578 }
 0x3d7   :  { %v1684_v2 = vpop.eup %1683 }
 0x3d8   :  { %353 = vrot.lane.b32.xlu2 %v1684_v2, %s1961_s19  ;;  %v1686_v26 = vpop.eup %1685 }
 0x3d9   :  { %v332_v9 = vadd.f32 1.0, %v1686_v26 }
 0x3db   :  { %v334_v13 = vmul.f32 0.5, %v332_v9 }
 0x42d   :  { %v453_v7 = vpop.permute.xlu1 %452 }
 0x42e   :  { %v455_v12 = vmul.f32 %v453_v7, %v437_v21  ;;  %v581_v21 = vmul.f32 %v2081_v8, %v579_v18 }
 0x430   :  { %457 = vrot.lane.b32.xlu1 %v455_v12, %s1961_s19  ;;  %v582_v22 = vadd.f32 %v2084_v11, %v581_v21 }
 0x432   :  { %v354_v14 = vpop.permute.xlu2 %353 }
 0x433   :  { %v2308_v15 = vmul.f32 %v354_v14, %v334_v13 }
 0x435   :  { %1599 = vmatmul.msk.f32.vlgmr.msrb.gmra.mxu3 %vm159_vm1, %v2308_v15  ;;  %1600 = vmatmul.msk.f32.vlgmr.msrb.gmra.mxu0 %vm159_vm1, %v2308_v15 }
 0x436   :  { %765 = vmatpush.msrb.mxu3 %v2055_v0  ;;  %813 = vmatpush.msrb.mxu0 %v2138_v35 }
 0x438   :  { %766 = vmatpush.msrb.mxu3 %v2057_v1  ;;  %814 = vmatpush.msrb.mxu0 %v2144_v37 }
 0x43a   :  { %767 = vmatpush.msrb.mxu3 %v2063_v4  ;;  %815 = vmatpush.msrb.mxu0 %v2162_v41 }
 0x43c   :  { %768 = vmatpush.msrb.mxu3 %v2070_v6  ;;  %816 = vmatpush.msrb.mxu0 %v2180_v45 }
 0x4a2   :  { %v458_v5 = vpop.permute.xlu1 %457 }
 0x4a3   :  { %1603 = vmatmul.msk.f32.vlgmr.msra.gmra.mxu2 %vm223_vm0, %v458_v5  ;;  %1604 = vmatmul.msk.f32.vlgmr.msra.gmra.mxu1 %vm223_vm0, %v458_v5 }
 0x4a4   :  { %643 = vmatpush.msra.mxu1 %v2138_v35  ;;  %732 = vmatpush.msra.mxu2 %v2103_v28 }
 0x4a6   :  { %644 = vmatpush.msra.mxu1 %v2144_v37  ;;  %733 = vmatpush.msra.mxu2 %v2108_v29 }
 0x4a8   :  { %645 = vmatpush.msra.mxu1 %v2162_v41  ;;  %734 = vmatpush.msra.mxu2 %v2114_v30 }
 0x4aa   :  { %646 = vmatpush.msra.mxu1 %v2180_v45  ;;  %735 = vmatpush.msra.mxu2 %v2130_v33 }
 0x4ab   :  { %1609 = vmatmul.msk.f32.vlgmr.msrb.gmra.mxu1 %vm223_vm0, %v458_v5 }
 0x4ac   :  { %712 = vmatpush.msrb.mxu1 %v2119_v31  ;;  %736 = vmatpush.msra.mxu2 %v2151_v39 }
 0x4ae   :  { %713 = vmatpush.msrb.mxu1 %v2124_v32  ;;  %737 = vmatpush.msra.mxu2 %v2169_v43 }
 0x4b0   :  { %714 = vmatpush.msrb.mxu1 %v2136_v34  ;;  %738 = vmatpush.msra.mxu2 %v2187_v47 }
 0x4b2   :  { %715 = vmatpush.msrb.mxu1 %v2158_v40  ;;  %739 = vmatpush.msra.mxu2 %v2201_v49  ;;  %v401_v16 = vpop.f32.mrf.mxu0 }
 0x4b3   :  { %v402_v17 = vadd.f32 %v401_v16, %v2284_v61 }
 0x4b4   :  { %716 = vmatpush.msrb.mxu1 %v2176_v44 }
 0x4b6   :  { %717 = vmatpush.msrb.mxu1 %v2194_v48 }
 0x4b8   :  { %718 = vmatpush.msrb.mxu1 %v2232_v53  ;;  %v381_v50 = vpop.f32.mrf.mxu3 }
 0x4b9   :  { %v382_v52 = vadd.f32 %v381_v50, %v2289_v10  ;;  %v528_v50 = vstv %s1605_s12 }
 0x4ba   :  { %719 = vmatpush.msrb.mxu1 %v2237_v54 }
 0x520   :  { %v498_v19 = vpop.f32.mrf.mxu1 }
 0x521   :  { %v499_v20 = vadd.f32 %v498_v19, %v402_v17 }
 0x523   :  { %1687 = vtanh.f32 %v499_v20 }
 0x526   :  { %v478_v51 = vpop.f32.mrf.mxu2 }
 0x527   :  { %v479_v55 = vadd.f32 %v478_v51, %v382_v52 }
 0x528   :  { %v600_v23 = vpop.f32.mrf.mxu1 }
 0x529   :  { %v1688_v24 = vpop.eup %1687  ;;  %v603_v25 = vadd.f32 %v600_v23, %v582_v22  ;;  %v501_v56 = vmul.f32 0.5, %v479_v55  ;;  %v502_v23 = vmul.f32 0.5, %v499_v20 }
 0x52a   :  { %512 = vrot.lane.b32.xlu2 %v1688_v24, %s1961_s19 }
 0x52b   :  { %1689 = vtanh.f32 %v603_v25  ;;  %v604_v3 = vmul.f32 0.5, %v603_v25 }
 0x52c   :  { %1691 = vtanh.f32 %v501_v56 }
 0x52d   :  { %1693 = vtanh.f32 %v604_v3 }
 0x531   :  { %v1690_v27 = vpop.eup %1689 }
 0x532   :  { %611 = vrot.lane.b32.xlu1 %v1690_v27, %s1960_s27  ;;  %v1692_v58 = vpop.eup %1691  ;;  %v358_v27 = vstv %s357_s8  ;;  %s1633_s8 = sld [smem:[#allocation12 + $0x5]] }
 0x533   :  { %v505_v59 = vadd.f32 1.0, %v1692_v58  ;;  %v1694_v26 = vpop.eup %1693  ;;  %v1615_v58 = vld [vmem:[%s2716_s0 + $0x18] sm:$0xff] }
 0x534   :  { %v606_v7 = vadd.f32 1.0, %v1694_v26 }
 0x535   :  { %v507_v60 = vmul.f32 0.5, %v505_v59 }
 0x536   :  { %v607_v9 = vmul.f32 0.5, %v606_v7 }
 0x537   :  { %v510_v14 = vmul.f32 %v507_v60, %v2303_v63 }
 0x538   :  { %v609_v18 = vmul.f32 %v607_v9, %v2299_v57  ;;  %v359_v57 = vmul.f32 %v358_v27, %v2308_v15 }
 0x584   :  { %v513_v62 = vpop.permute.xlu2 %512 }
 0x585   :  { %v515_v2 = vmul.f32 %v513_v62, %v507_v60 }
 0x587   :  { %517 = vrot.lane.b32.xlu1 %v515_v2, %s1961_s19 }
 0x5a4   :  { %v612_v12 = vpop.permute.xlu1 %611 }
 0x5a5   :  { %v614_v13 = vmul.f32 %v612_v12, %v607_v9 }
 0x5a7   :  { %616 = vrot.lane.b32.xlu0 %v614_v13, %s1960_s27 }
 0x5f9   :  { %v518_v5 = vpop.permute.xlu1 %517 }
 0x5fa   :  { %v2354_v16 = vadd.f32 %v518_v5, %v510_v14 }
 0x5fc   :  { %1695 = vtanh.f32 %v2354_v16 }
 0x602   :  { %v1696_v17 = vpop.eup %1695 }
 0x603   :  { %523 = vrot.lane.b32.xlu0 %v1696_v17, %s1961_s19 }
 0x619   :  { %v617_v19 = vpop.permute.xlu0 %616 }
 0x61a   :  { %v2359_v21 = vadd.f32 %v617_v19, %v609_v18 }
 0x61c   :  { %1697 = vtanh.f32 %v2359_v21 }
 0x61d   :  { %1699 = vtanh.f32 %v502_v23 }
 0x622   :  { %v1698_v22 = vpop.eup %1697 }
 0x623   :  { %622 = vrot.lane.b32.xlu2 %v1698_v22, %s1960_s27  ;;  %v1700_v63 = vpop.eup %1699 }
 0x624   :  { %v506_v24 = vadd.f32 1.0, %v1700_v63 }
 0x626   :  { %v508_v25 = vmul.f32 0.5, %v506_v24 }
 0x62b   :  { %748 = vperm.xlu2 %1663, %v1615_v58  }
 0x675   :  { %v524_v51 = vpop.permute.xlu0 %523 }
 0x676   :  { %v526_v52 = vmul.f32 %v524_v51, %v508_v25 }
 0x678   :  { %v529_v55 = vmul.f32 %v528_v50, %v526_v52  ;;  %1606 = vmatmul.msk.f32.vlgmr.msrb.gmra.mxu2 %vm159_vm1, %v526_v52  ;;  %1607 = vmatmul.msk.f32.vlgmr.msra.gmra.mxu3 %vm159_vm1, %v526_v52 }
 0x679   :  { %935 = vmatpush.msrb.mxu2 %v2055_v0  ;;  %833 = vmatpush.msra.mxu3 %v2140_v36 }
 0x67a   :  { %v2368_v20 = vadd.f32 %v529_v55, %v359_v57 }
 0x67b   :  { %936 = vmatpush.msrb.mxu2 %v2057_v1  ;;  %834 = vmatpush.msra.mxu3 %v2146_v38 }
 0x67d   :  { %937 = vmatpush.msrb.mxu2 %v2063_v4  ;;  %835 = vmatpush.msra.mxu3 %v2164_v42  ;;  %v623_v15 = vpop.permute.xlu2 %622 }
 0x67e   :  { %v625_v56 = vmul.f32 %v623_v15, %v607_v9 }
 0x67f   :  { %938 = vmatpush.msrb.mxu2 %v2070_v6  ;;  %836 = vmatpush.msra.mxu3 %v2182_v46 }
 0x680   :  { %627 = vrot.lane.b32.xlu1 %v625_v56, %s1961_s19 }
 0x685   :  { %v749_v62 = vpop.permute.xlu2 %748 }
 0x686   :  { %v751_v26 = vmul.f32 %v2081_v8, %v749_v62 }
 0x688   :  { %v752_v9 = vadd.f32 %v2084_v11, %v751_v26 }
 0x6f2   :  { %v628_v59 = vpop.permute.xlu1 %627 }
 0x6f3   :  { %1610 = vmatmul.msk.f32.vlgmr.msra.gmra.mxu1 %vm223_vm0, %v628_v59  ;;  %1611 = vmatmul.msk.f32.vlgmr.msra.gmra.mxu0 %vm223_vm0, %v628_v59 }
 0x6f4   :  { %1616 = vmatmul.msk.f32.vlgmr.msrb.gmra.mxu3 %vm223_vm0, %v628_v59  ;;  %882 = vmatpush.msra.mxu0 %v2119_v31 }
 0x6f5   :  { %902 = vmatpush.msra.mxu1 %v2103_v28  ;;  %983 = vmatpush.msrb.mxu3 %v2138_v35 }
 0x6f6   :  { %883 = vmatpush.msra.mxu0 %v2124_v32 }
 0x6f7   :  { %903 = vmatpush.msra.mxu1 %v2108_v29  ;;  %984 = vmatpush.msrb.mxu3 %v2144_v37 }
 0x6f8   :  { %884 = vmatpush.msra.mxu0 %v2136_v34 }
 0x6f9   :  { %904 = vmatpush.msra.mxu1 %v2114_v30  ;;  %985 = vmatpush.msrb.mxu3 %v2162_v41 }
 0x6fa   :  { %885 = vmatpush.msra.mxu0 %v2158_v40 }
 0x6fb   :  { %905 = vmatpush.msra.mxu1 %v2130_v33  ;;  %986 = vmatpush.msrb.mxu3 %v2180_v45  ;;  %v571_v60 = vpop.f32.mrf.mxu3  ;;  %v551_v17 = vpop.f32.mrf.mxu2 }
 0x6fc   :  { %886 = vmatpush.msra.mxu0 %v2176_v44  ;;  %v572_v2 = vadd.f32 %v571_v60, %v2284_v61  ;;  %v552_v19 = vadd.f32 %v551_v17, %v2289_v10 }
 0x6fd   :  { %906 = vmatpush.msra.mxu1 %v2151_v39 }
 0x6fe   :  { %887 = vmatpush.msra.mxu0 %v2194_v48 }
 0x6ff   :  { %907 = vmatpush.msra.mxu1 %v2169_v43 }
 0x700   :  { %888 = vmatpush.msra.mxu0 %v2232_v53 }
 0x701   :  { %908 = vmatpush.msra.mxu1 %v2187_v47 }
 0x702   :  { %889 = vmatpush.msra.mxu0 %v2237_v54 }
 0x703   :  { %909 = vmatpush.msra.mxu1 %v2201_v49 }
 0x770   :  { %v668_v3 = vpop.f32.mrf.mxu0  ;;  %v648_v18 = vpop.f32.mrf.mxu1 }
 0x771   :  { %v669_v7 = vadd.f32 %v668_v3, %v572_v2  ;;  %v649_v22 = vadd.f32 %v648_v18, %v552_v19 }
 0x773   :  { %1701 = vtanh.f32 %v669_v7  ;;  %v671_v23 = vmul.f32 0.5, %v649_v22 }
 0x777   :  { %v770_v12 = vpop.f32.mrf.mxu3 }
 0x778   :  { %v773_v13 = vadd.f32 %v770_v12, %v752_v9  ;;  %v672_v12 = vmul.f32 0.5, %v669_v7 }
 0x779   :  { %v1702_v14 = vpop.eup %1701 }
 0x77a   :  { %1703 = vtanh.f32 %v773_v13  ;;  %682 = vrot.lane.b32.xlu1 %v1702_v14, %s1961_s19  ;;  %v774_v63 = vmul.f32 0.5, %v773_v13 }
 0x77b   :  { %1705 = vtanh.f32 %v671_v23 }
 0x77c   :  { %1707 = vtanh.f32 %v774_v63 }
 0x780   :  { %v1704_v5 = vpop.eup %1703 }
 0x781   :  { %781 = vrot.lane.b32.xlu0 %v1704_v5, %s1960_s27  ;;  %v1706_v24 = vpop.eup %1705  ;;  %v698_v5 = vstv %s1612_s28 }
 0x782   :  { %v675_v25 = vadd.f32 1.0, %v1706_v24  ;;  %v1708_v27 = vpop.eup %1707 }
 0x783   :  { %v776_v57 = vadd.f32 1.0, %v1708_v27 }
 0x784   :  { %v677_v50 = vmul.f32 0.5, %v675_v25 }
 0x785   :  { %v777_v55 = vmul.f32 0.5, %v776_v57 }
 0x786   :  { %v680_v2 = vmul.f32 %v677_v50, %v2354_v16 }
 0x787   :  { %v779_v58 = vmul.f32 %v777_v55, %v2359_v21 }
 0x7ec   :  { %v683_v51 = vpop.permute.xlu1 %682 }
 0x7ed   :  { %v685_v52 = vmul.f32 %v683_v51, %v677_v50 }
 0x7ef   :  { %687 = vrot.lane.b32.xlu0 %v685_v52, %s1961_s19 }
 0x7f3   :  { %v782_v15 = vpop.permute.xlu0 %781 }
 0x7f4   :  { %v784_v56 = vmul.f32 %v782_v15, %v777_v55 }
 0x7f6   :  { %786 = vrot.lane.b32.xlu2 %v784_v56, %s1960_s27 }
 0x850   :  { %v787_v59 = vpop.permute.xlu2 %786 }
 0x851   :  { %v2412_v60 = vadd.f32 %v787_v59, %v779_v58 }
 0x853   :  { %1709 = vtanh.f32 %v2412_v60 }
 0x859   :  { %v1710_v62 = vpop.eup %1709 }
 0x85a   :  { %792 = vrot.lane.b32.xlu1 %v1710_v62, %s1960_s27 }
 0x861   :  { %v688_v3 = vpop.permute.xlu0 %687 }
 0x862   :  { %v2417_v26 = vadd.f32 %v688_v3, %v680_v2 }
 0x864   :  { %1711 = vtanh.f32 %v2417_v26 }
 0x865   :  { %1713 = vtanh.f32 %v672_v12 }
 0x86a   :  { %v1712_v9 = vpop.eup %1711 }
 0x86b   :  { %693 = vrot.lane.b32.xlu2 %v1712_v9, %s1961_s19  ;;  %v1714_v21 = vpop.eup %1713 }
 0x86c   :  { %v676_v13 = vadd.f32 1.0, %v1714_v21 }
 0x86e   :  { %v678_v14 = vmul.f32 0.5, %v676_v13 }
 0x8c5   :  { %v694_v17 = vpop.permute.xlu2 %693 }
 0x8c6   :  { %v696_v18 = vmul.f32 %v694_v17, %v678_v14 }
 0x8c8   :  { %v699_v19 = vmul.f32 %v698_v5, %v696_v18  ;;  %1613 = vmatmul.msk.f32.vlgmr.msrb.gmra.mxu1 %vm159_vm1, %v696_v18  ;;  %1614 = vmatmul.msk.f32.vlgmr.msra.gmra.mxu2 %vm159_vm1, %v696_v18 }
 0x8c9   :  { %1105 = vmatpush.msrb.mxu1 %v2055_v0  ;;  %1003 = vmatpush.msra.mxu2 %v2140_v36  ;;  %v1622_v0 = vld [vmem:[%s2716_s0 + $0x20] sm:$0xff] }
 0x8ca   :  { %v2426_v16 = vadd.f32 %v699_v19, %v2368_v20  ;;  %918 = vperm.xlu1 %1664, %v1622_v0  }
 0x8cb   :  { %1106 = vmatpush.msrb.mxu1 %v2057_v1  ;;  %1004 = vmatpush.msra.mxu2 %v2146_v38 }
 0x8cc   :  { %v793_v7 = vpop.permute.xlu1 %792 }
 0x8cd   :  { %v795_v22 = vmul.f32 %v793_v7, %v777_v55  ;;  %1107 = vmatpush.msrb.mxu1 %v2063_v4  ;;  %1005 = vmatpush.msra.mxu2 %v2164_v42 }
 0x8cf   :  { %797 = vrot.lane.b32.xlu0 %v795_v22, %s1961_s19  ;;  %1108 = vmatpush.msrb.mxu1 %v2070_v6 }
 0x8d0   :  { %1006 = vmatpush.msra.mxu2 %v2182_v46 }
 0x93c   :  { %v919_v4 = vpop.permute.xlu1 %918 }
 0x93d   :  { %v921_v20 = vmul.f32 %v2081_v8, %v919_v4 }
 0x93f   :  { %v922_v23 = vadd.f32 %v2084_v11, %v921_v20 }
 0x941   :  { %v798_v1 = vpop.permute.xlu0 %797 }
 0x942   :  { %1617 = vmatmul.msk.f32.vlgmr.msrb.gmra.mxu0 %vm223_vm0, %v798_v1  ;;  %1618 = vmatmul.msk.f32.vlgmr.msra.gmra.mxu3 %vm223_vm0, %v798_v1 }
 0x943   :  { %1623 = vmatmul.msk.f32.vlgmr.msrb.gmra.mxu2 %vm223_vm0, %v798_v1  ;;  %1052 = vmatpush.msra.mxu3 %v2119_v31 }
 0x944   :  { %1072 = vmatpush.msrb.mxu0 %v2103_v28  ;;  %1153 = vmatpush.msrb.mxu2 %v2138_v35 }
 0x945   :  { %1053 = vmatpush.msra.mxu3 %v2124_v32  ;;  %v721_v15 = vpop.f32.mrf.mxu1 }
 0x946   :  { %1073 = vmatpush.msrb.mxu0 %v2108_v29  ;;  %1154 = vmatpush.msrb.mxu2 %v2144_v37  ;;  %v722_v56 = vadd.f32 %v721_v15, %v2289_v10 }
 0x947   :  { %1054 = vmatpush.msra.mxu3 %v2136_v34 }
 0x948   :  { %1074 = vmatpush.msrb.mxu0 %v2114_v30  ;;  %1155 = vmatpush.msrb.mxu2 %v2162_v41 }
 0x949   :  { %1055 = vmatpush.msra.mxu3 %v2158_v40 }
 0x94a   :  { %1075 = vmatpush.msrb.mxu0 %v2130_v33  ;;  %1156 = vmatpush.msrb.mxu2 %v2180_v45 }
 0x94b   :  { %1056 = vmatpush.msra.mxu3 %v2176_v44  ;;  %v741_v6 = vpop.f32.mrf.mxu2 }
 0x94c   :  { %1076 = vmatpush.msrb.mxu0 %v2151_v39  ;;  %v742_v63 = vadd.f32 %v741_v6, %v2284_v61 }
 0x94d   :  { %1057 = vmatpush.msra.mxu3 %v2194_v48 }
 0x94e   :  { %1077 = vmatpush.msrb.mxu0 %v2169_v43 }
 0x94f   :  { %1058 = vmatpush.msra.mxu3 %v2232_v53 }
 0x950   :  { %1078 = vmatpush.msrb.mxu0 %v2187_v47 }
 0x951   :  { %1059 = vmatpush.msra.mxu3 %v2237_v54 }
 0x952   :  { %1079 = vmatpush.msrb.mxu0 %v2201_v49 }
 0x9bf   :  { %v818_v11 = vpop.f32.mrf.mxu0 }
 0x9c0   :  { %v819_v62 = vadd.f32 %v818_v11, %v722_v56 }
 0x9c2   :  { %v841_v3 = vmul.f32 0.5, %v819_v62 }
 0x9c5   :  { %v838_v24 = vpop.f32.mrf.mxu3 }
 0x9c6   :  { %v839_v25 = vadd.f32 %v838_v24, %v742_v63  ;;  %v940_v27 = vpop.f32.mrf.mxu2 }
 0x9c7   :  { %v943_v50 = vadd.f32 %v940_v27, %v922_v23  ;;  %v868_v23 = vstv %s1619_s30 }
 0x9c8   :  { %1715 = vtanh.f32 %v839_v25 }
 0x9c9   :  { %1717 = vtanh.f32 %v943_v50  ;;  %v944_v57 = vmul.f32 0.5, %v943_v50 }
 0x9cb   :  { %1719 = vtanh.f32 %v944_v57  ;;  %v2492_v57 = vld [vmem:[#allocation8 + $0x10] sm:$0xff] }
 0x9cc   :  { %1721 = vtanh.f32 %v841_v3 }
 0x9ce   :  { %v1716_v51 = vpop.eup %1715 }
 0x9cf   :  { %v1718_v52 = vpop.eup %1717  ;;  %852 = vrot.lane.b32.xlu0 %v1716_v51, %s1961_s19 }
 0x9d0   :  { %951 = vrot.lane.b32.xlu2 %v1718_v52, %s1960_s27  ;;  %v2485_v52 = vld [vmem:[#allocation8 + $0x18] sm:$0xff] }
 0x9d1   :  { %v1720_v55 = vpop.eup %1719 }
 0x9d2   :  { %v946_v8 = vadd.f32 1.0, %v1720_v55  ;;  %v1722_v9 = vpop.eup %1721  ;;  %v2496_v55 = vld [vmem:[#allocation8 + $0x8] sm:$0xff] }
 0x9d3   :  { %v845_v12 = vadd.f32 1.0, %v1722_v9 }
 0x9d4   :  { %v947_v58 = vmul.f32 0.5, %v946_v8  ;;  %v2500_v8 = vld [vmem:[#allocation8] sm:$0xff] }
 0x9d5   :  { %v847_v21 = vmul.f32 0.5, %v845_v12 }
 0x9d6   :  { %v949_v17 = vmul.f32 %v947_v58, %v2412_v60  ;;  %v1629_v60 = vld [vmem:[%s2716_s0 + $0x28] sm:$0xff] }
 0x9d7   :  { %v850_v5 = vmul.f32 %v847_v21, %v2417_v26  ;;  %v842_v26 = vmul.f32 0.5, %v839_v25 }
 0xa2a   :  { %v952_v59 = vpop.permute.xlu2 %951 }
 0xa2b   :  { %v954_v2 = vmul.f32 %v952_v59, %v947_v58 }
 0xa2d   :  { %956 = vrot.lane.b32.xlu1 %v954_v2, %s1960_s27 }
 0xa41   :  { %v853_v13 = vpop.permute.xlu0 %852 }
 0xa42   :  { %v855_v14 = vmul.f32 %v853_v13, %v847_v21 }
 0xa44   :  { %857 = vrot.lane.b32.xlu2 %v855_v14, %s1961_s19 }
 0xa9e   :  { %v858_v18 = vpop.permute.xlu2 %857 }
 0xa9f   :  { %v957_v19 = vpop.permute.xlu1 %956  ;;  %v2471_v7 = vadd.f32 %v858_v18, %v850_v5  ;;  %v1636_v5 = vld [vmem:[%s2716_s0 + $0x30] sm:$0xff] }
 0xaa0   :  { %v2473_v22 = vadd.f32 %v957_v19, %v949_v17 }
 0xaa1   :  { %1723 = vtanh.f32 %v2471_v7 }
 0xaa2   :  { %1725 = vtanh.f32 %v2473_v22 }
 0xaa3   :  { %1727 = vtanh.f32 %v842_v26 }
 0xaa7   :  { %v1724_v0 = vpop.eup %1723 }
 0xaa8   :  { %v1726_v1 = vpop.eup %1725  ;;  %863 = vrot.lane.b32.xlu1 %v1724_v0, %s1961_s19 }
 0xaa9   :  { %962 = vrot.lane.b32.xlu0 %v1726_v1, %s1960_s27  ;;  %v1728_v4 = vpop.eup %1727  ;;  %v1038_v1 = vstv %s1626_s3 }
 0xaaa   :  { %v846_v6 = vadd.f32 1.0, %v1728_v4 }
 0xaac   :  { %v848_v20 = vmul.f32 0.5, %v846_v6  ;;  %v2559_v6 = vld [vmem:[#allocation11 + $0x38] sm:$0xff] }
 0xab1   :  { %1088 = vperm.xlu0 %1662, %v1629_v60  }
 0xb1a   :  { %v864_v63 = vpop.permute.xlu1 %863 }
 0xb1b   :  { %v963_v24 = vpop.permute.xlu0 %962  ;;  %v866_v27 = vmul.f32 %v864_v63, %v848_v20  ;;  %v2570_v63 = vld [vmem:[#allocation11 + $0x18] sm:$0xff] }
 0xb1c   :  { %v965_v50 = vmul.f32 %v963_v24, %v947_v58  ;;  %v2574_v24 = vld [vmem:[#allocation11 + $0x8] sm:$0xff] }
 0xb1d   :  { %v869_v51 = vmul.f32 %v868_v23, %v866_v27  ;;  %1620 = vmatmul.msk.f32.vlgmr.msra.gmra.mxu0 %vm159_vm1, %v866_v27  ;;  %1621 = vmatmul.msk.f32.vlgmr.msra.gmra.mxu1 %vm159_vm1, %v866_v27  ;;  %v2566_v23 = vld [vmem:[#allocation11 + $0x28] sm:$0xff] }
 0xb1e   :  { %967 = vrot.lane.b32.xlu2 %v965_v50, %s1961_s19  ;;  %1275 = vmatpush.msra.mxu0 %v2485_v52  ;;  %v1789_v50 = vld [vmem:[%s2725_s9 + $0x70] sm:$0xff] }
 0xb1f   :  { %v2489_v25 = vadd.f32 %v869_v51, %v2426_v16  ;;  %1173 = vmatpush.msra.mxu1 %v2140_v36  ;;  %v1790_v51 = vld [vmem:[%s2725_s9 + $0x78] sm:$0xff] }
 0xb20   :  { %1276 = vmatpush.msra.mxu0 %v2492_v57 }
 0xb21   :  { %1174 = vmatpush.msra.mxu1 %v2146_v38 }
 0xb22   :  { %1277 = vmatpush.msra.mxu0 %v2496_v55 }
 0xb23   :  { %1175 = vmatpush.msra.mxu1 %v2164_v42 }
 0xb24   :  { %1278 = vmatpush.msra.mxu0 %v2500_v8 }
 0xb25   :  { %1176 = vmatpush.msra.mxu1 %v2182_v46 }
 0xb78   :  { %v968_v16 = vpop.permute.xlu2 %967 }
 0xb79   :  { %1624 = vmatmul.msk.f32.vlgmr.msrb.gmra.mxu3 %vm223_vm0, %v968_v16  ;;  %1625 = vmatmul.msk.f32.vlgmr.msra.gmra.mxu2 %vm223_vm0, %v968_v16 }
 0xb7a   :  { %1630 = vmatmul.msk.f32.vlgmr.msrb.gmra.mxu1 %vm223_vm0, %v968_v16  ;;  %1222 = vmatpush.msra.mxu2 %v2119_v31  ;;  %v1796_v16 = vld [vmem:[%s2725_s9 + $0x58] sm:$0xff] }
 0xb7b   :  { %1242 = vmatpush.msrb.mxu3 %v2103_v28  ;;  %1323 = vmatpush.msrb.mxu1 %v2138_v35  ;;  %v1089_v28 = vpop.permute.xlu0 %1088 }
 0xb7c   :  { %1223 = vmatpush.msra.mxu2 %v2124_v32  ;;  %v2533_v32 = vld [vmem:[#allocation9] ss:$0 sm:$0xff] }
 0xb7d   :  { %1243 = vmatpush.msrb.mxu3 %v2108_v29  ;;  %1324 = vmatpush.msrb.mxu1 %v2144_v37 }
 0xb7e   :  { %1224 = vmatpush.msra.mxu2 %v2136_v34 }
 0xb7f   :  { %1244 = vmatpush.msrb.mxu3 %v2114_v30  ;;  %1325 = vmatpush.msrb.mxu1 %v2162_v41  ;;  %v2530_v30 = vld [vmem:[%s2721_s5] ss:$0 sm:$0xff] }
 0xb80   :  { %1225 = vmatpush.msra.mxu2 %v2158_v40  ;;  %v1091_v31 = vmul.f32 %v2530_v30, %v1089_v28  ;;  %v1797_v28 = vld [vmem:[#allocation11 + $0x10] sm:$0xff] }
 0xb81   :  { %1245 = vmatpush.msrb.mxu3 %v2130_v33  ;;  %1326 = vmatpush.msrb.mxu1 %v2180_v45 }
 0xb82   :  { %1226 = vmatpush.msra.mxu2 %v2176_v44  ;;  %v1092_v33 = vadd.f32 %v2533_v32, %v1091_v31  ;;  %v1799_v31 = vld [vmem:[%s2725_s9 + $0x48] sm:$0xff] }
 0xb83   :  { %1246 = vmatpush.msrb.mxu3 %v2151_v39 }
 0xb84   :  { %1227 = vmatpush.msra.mxu2 %v2194_v48 }
 0xb85   :  { %1247 = vmatpush.msrb.mxu3 %v2169_v43 }
 0xb86   :  { %1228 = vmatpush.msra.mxu2 %v2232_v53 }
 0xb87   :  { %1248 = vmatpush.msrb.mxu3 %v2187_v47 }
 0xb88   :  { %1229 = vmatpush.msra.mxu2 %v2237_v54 }
 0xb89   :  { %1249 = vmatpush.msrb.mxu3 %v2201_v49 }
 0xb9a   :  { %v911_v29 = vpop.f32.mrf.mxu1  ;;  %v891_v41 = vpop.f32.mrf.mxu0 }
 0xb9b   :  { %v912_v36 = vadd.f32 %v911_v29, %v2284_v61  ;;  %v892_v43 = vadd.f32 %v891_v41, %v2289_v10  ;;  %v1798_v29 = vld [vmem:[%s2725_s9 + $0x40] sm:$0xff]  ;;  %v1808_v41 = vld [vmem:[%s2725_s9 + $0x8] sm:$0xff] }
 0xbf7   :  { %v1110_v34 = vpop.f32.mrf.mxu1 }
 0xbf8   :  { %v1113_v35 = vadd.f32 %v1110_v34, %v1092_v33  ;;  %v1800_v33 = vld [vmem:[#allocation11] sm:$0xff] }
 0xbf9   :  { %v1801_v34 = vld [vmem:[%s2725_s9 + $0x30] sm:$0xff] }
 0xbfa   :  { %1729 = vtanh.f32 %v1113_v35  ;;  %v1114_v53 = vmul.f32 0.5, %v1113_v35  ;;  %v1802_v35 = vld [vmem:[%s2725_s9 + $0x38] sm:$0xff] }
 0xbfc   :  { %v1008_v37 = vpop.f32.mrf.mxu2  ;;  %v988_v42 = vpop.f32.mrf.mxu3 }
 0xbfd   :  { %v1009_v38 = vadd.f32 %v1008_v37, %v912_v36  ;;  %v989_v44 = vadd.f32 %v988_v42, %v892_v43  ;;  %v1803_v36 = vld [vmem:[%s2725_s9 + $0x20] sm:$0xff]  ;;  %v1804_v37 = vld [vmem:[%s2725_s9 + $0x28] sm:$0xff] }
 0xbff   :  { %1731 = vtanh.f32 %v1009_v38  ;;  %v1011_v45 = vmul.f32 0.5, %v989_v44  ;;  %v1012_v17 = vmul.f32 0.5, %v1009_v38  ;;  %v1805_v38 = vld [vmem:[%s2725_s9 + $0x10] sm:$0xff] }
 0xc00   :  { %v1730_v39 = vpop.eup %1729 }
 0xc01   :  { %1121 = vrot.lane.b32.xlu1 %v1730_v39, %s1960_s27  ;;  %1733 = vtanh.f32 %v1011_v45  ;;  %v1806_v39 = vld [vmem:[%s2725_s9 + $0x18] sm:$0xff] }
 0xc02   :  { %1735 = vtanh.f32 %v1114_v53 }
 0xc05   :  { %v1732_v40 = vpop.eup %1731 }
 0xc06   :  { %1022 = vrot.lane.b32.xlu2 %v1732_v40, %s1961_s19  ;;  %v1807_v40 = vld [vmem:[%s2725_s9] sm:$0xff] }
 0xc07   :  { %v1734_v46 = vpop.eup %1733 }
 0xc08   :  { %v1015_v47 = vadd.f32 1.0, %v1734_v46  ;;  %v1736_v15 = vpop.eup %1735 }
 0xc09   :  { %v1116_v11 = vadd.f32 1.0, %v1736_v15 }
 0xc0a   :  { %v1017_v48 = vmul.f32 0.5, %v1015_v47 }
 0xc0b   :  { %v1117_v56 = vmul.f32 0.5, %v1116_v11 }
 0xc0c   :  { %v1020_v62 = vmul.f32 %v1017_v48, %v2471_v7 }
 0xc0d   :  { %v1119_v12 = vmul.f32 %v1117_v56, %v2473_v22 }
 0xc60   :  { %v1023_v49 = vpop.permute.xlu2 %1022 }
 0xc61   :  { %v1025_v54 = vmul.f32 %v1023_v49, %v1017_v48 }
 0xc63   :  { %1027 = vrot.lane.b32.xlu1 %v1025_v54, %s1961_s19 }
 0xc73   :  { %v1122_v58 = vpop.permute.xlu1 %1121 }
 0xc74   :  { %v1124_v59 = vmul.f32 %v1122_v58, %v1117_v56 }
 0xc76   :  { %1126 = vrot.lane.b32.xlu0 %v1124_v59, %s1960_s27 }
 0xcd5   :  { %v1028_v2 = vpop.permute.xlu1 %1027 }
 0xcd6   :  { %v2543_v3 = vadd.f32 %v1028_v2, %v1020_v62 }
 0xcd8   :  { %1737 = vtanh.f32 %v2543_v3 }
 0xcde   :  { %v1738_v9 = vpop.eup %1737 }
 0xcdf   :  { %1033 = vrot.lane.b32.xlu0 %v1738_v9, %s1961_s19 }
 0xce8   :  { %v1127_v21 = vpop.permute.xlu0 %1126 }
 0xce9   :  { %v2548_v13 = vadd.f32 %v1127_v21, %v1119_v12 }
 0xceb   :  { %1739 = vtanh.f32 %v2548_v13 }
 0xcec   :  { %1741 = vtanh.f32 %v1012_v17 }
 0xcf1   :  { %v1740_v14 = vpop.eup %1739 }
 0xcf2   :  { %1132 = vrot.lane.b32.xlu2 %v1740_v14, %s1960_s27  ;;  %v1742_v18 = vpop.eup %1741 }
 0xcf3   :  { %v1016_v7 = vadd.f32 1.0, %v1742_v18 }
 0xcf5   :  { %v1018_v0 = vmul.f32 0.5, %v1016_v7 }
 0xcfa   :  { %1258 = vperm.xlu2 %1663, %v1636_v5  }
 0xd4c   :  { %v1133_v19 = vpop.permute.xlu2 %1132 }
 0xd4d   :  { %v1135_v22 = vmul.f32 %v1133_v19, %v1117_v56 }
 0xd4f   :  { %1137 = vrot.lane.b32.xlu1 %v1135_v22, %s1961_s19 }
 0xd51   :  { %v1034_v60 = vpop.permute.xlu0 %1033 }
 0xd52   :  { %v1036_v26 = vmul.f32 %v1034_v60, %v1018_v0 }
 0xd54   :  { %v1039_v4 = vmul.f32 %v1038_v1, %v1036_v26  ;;  %1627 = vmatmul.msk.f32.vlgmr.msra.gmra.mxu3 %vm159_vm1, %v1036_v26  ;;  %1628 = vmatmul.msk.f32.vlgmr.msrb.gmra.mxu0 %vm159_vm1, %v1036_v26  ;;  %v1259_v42 = vpop.permute.xlu2 %1258 }
 0xd55   :  { %1445 = vmatpush.msra.mxu3 %v2485_v52  ;;  %1343 = vmatpush.msrb.mxu0 %v2559_v6  ;;  %v1791_v52 = vld [vmem:[#allocation11 + $0x30] sm:$0xff]  ;;  %v1261_v44 = vmul.f32 %v2530_v30, %v1259_v42 }
 0xd56   :  { %v2563_v20 = vadd.f32 %v1039_v4, %v2489_v25  ;;  %v1792_v25 = vld [vmem:[%s2725_s9 + $0x60] sm:$0xff]  ;;  %v1643_v4 = vld [vmem:[%s2716_s0 + $0x38] sm:$0xff]  ;;  %s1640_s0 = sld [smem:[#allocation12 + $0x6]] }
 0xd57   :  { %1446 = vmatpush.msra.mxu3 %v2492_v57  ;;  %1344 = vmatpush.msrb.mxu0 %v2566_v23  ;;  %v1793_v57 = vld [vmem:[%s2725_s9 + $0x68] sm:$0xff]  ;;  %v1262_v47 = vadd.f32 %v2533_v32, %v1261_v44 }
 0xd59   :  { %1447 = vmatpush.msra.mxu3 %v2496_v55  ;;  %1345 = vmatpush.msrb.mxu0 %v2570_v63  ;;  %v1794_v55 = vld [vmem:[#allocation11 + $0x20] sm:$0xff] }
 0xd5b   :  { %1448 = vmatpush.msra.mxu3 %v2500_v8  ;;  %1346 = vmatpush.msrb.mxu0 %v2574_v24  ;;  %v1795_v8 = vld [vmem:[%s2725_s9 + $0x50] sm:$0xff] }
 0xdc1   :  { %v1138_v27 = vpop.permute.xlu1 %1137 }
 0xdc2   :  { %1631 = vmatmul.msk.f32.vlgmr.msrb.gmra.mxu2 %vm223_vm0, %v1138_v27  ;;  %1632 = vmatmul.msk.f32.vlgmr.msra.gmra.mxu1 %vm223_vm0, %v1138_v27 }
 0xdc3   :  { %1637 = vmatmul.msk.f32.vlgmr.msra.gmra.mxu0 %vm223_vm0, %v1138_v27  ;;  %1392 = vmatpush.msra.mxu1 %v1789_v50 }
 0xdc4   :  { %1412 = vmatpush.msrb.mxu2 %v1790_v51  ;;  %1493 = vmatpush.msra.mxu0 %v1791_v52 }
 0xdc5   :  { %1393 = vmatpush.msra.mxu1 %v1792_v25 }
 0xdc6   :  { %1413 = vmatpush.msrb.mxu2 %v1793_v57  ;;  %1494 = vmatpush.msra.mxu0 %v1794_v55 }
 0xdc7   :  { %1394 = vmatpush.msra.mxu1 %v1795_v8  ;;  %v1208_v8 = vstv %s1633_s8 }
 0xdc8   :  { %1414 = vmatpush.msrb.mxu2 %v1796_v16  ;;  %1495 = vmatpush.msra.mxu0 %v1797_v28 }
 0xdc9   :  { %1395 = vmatpush.msra.mxu1 %v1798_v29 }
 0xdca   :  { %1415 = vmatpush.msrb.mxu2 %v1799_v31  ;;  %1496 = vmatpush.msra.mxu0 %v1800_v33 }
 0xdcb   :  { %1396 = vmatpush.msra.mxu1 %v1801_v34 }
 0xdcc   :  { %1416 = vmatpush.msrb.mxu2 %v1802_v35 }
 0xdcd   :  { %1397 = vmatpush.msra.mxu1 %v1803_v36 }
 0xdce   :  { %1417 = vmatpush.msrb.mxu2 %v1804_v37 }
 0xdcf   :  { %1398 = vmatpush.msra.mxu1 %v1805_v38 }
 0xdd0   :  { %1418 = vmatpush.msrb.mxu2 %v1806_v39 }
 0xdd1   :  { %1399 = vmatpush.msra.mxu1 %v1807_v40  ;;  %v1081_v43 = vpop.f32.mrf.mxu0 }
 0xdd2   :  { %1419 = vmatpush.msrb.mxu2 %v1808_v41  ;;  %v1082_v45 = vadd.f32 %v1081_v43, %v2284_v61 }
 0xdd7   :  { %v1061_v11 = vpop.f32.mrf.mxu3 }
 0xdd8   :  { %v1062_v58 = vadd.f32 %v1061_v11, %v2289_v10 }
 0xe3f   :  { %v1178_v46 = vpop.f32.mrf.mxu1 }
 0xe40   :  { %v1179_v48 = vadd.f32 %v1178_v46, %v1082_v45  ;;  %v1280_v49 = vpop.f32.mrf.mxu0 }
 0xe41   :  { %v1283_v53 = vadd.f32 %v1280_v49, %v1262_v47 }
 0xe42   :  { %1743 = vtanh.f32 %v1179_v48  ;;  %v1182_v52 = vmul.f32 0.5, %v1179_v48 }
 0xe43   :  { %1745 = vtanh.f32 %v1283_v53  ;;  %v1284_v2 = vmul.f32 0.5, %v1283_v53 }
 0xe45   :  { %v1158_v56 = vpop.f32.mrf.mxu2 }
 0xe46   :  { %v1159_v59 = vadd.f32 %v1158_v56, %v1062_v58 }
 0xe48   :  { %v1744_v54 = vpop.eup %1743  ;;  %v1181_v62 = vmul.f32 0.5, %v1159_v59 }
 0xe49   :  { %v1746_v15 = vpop.eup %1745  ;;  %1192 = vrot.lane.b32.xlu1 %v1744_v54, %s1961_s19 }
 0xe4a   :  { %1291 = vrot.lane.b32.xlu0 %v1746_v15, %s1960_s27  ;;  %1747 = vtanh.f32 %v1181_v62 }
 0xe4b   :  { %1749 = vtanh.f32 %v1284_v2 }
 0xe50   :  { %v1748_v9 = vpop.eup %1747 }
 0xe51   :  { %v1750_v12 = vpop.eup %1749  ;;  %v1185_v21 = vadd.f32 1.0, %v1748_v9 }
 0xe52   :  { %v1286_v14 = vadd.f32 1.0, %v1750_v12 }
 0xe53   :  { %v1187_v5 = vmul.f32 0.5, %v1185_v21 }
 0xe54   :  { %v1287_v17 = vmul.f32 0.5, %v1286_v14 }
 0xe55   :  { %v1190_v27 = vmul.f32 %v1187_v5, %v2543_v3 }
 0xe56   :  { %v1289_v0 = vmul.f32 %v1287_v17, %v2548_v13 }
 0xebb   :  { %v1193_v18 = vpop.permute.xlu1 %1192 }
 0xebc   :  { %v1292_v19 = vpop.permute.xlu0 %1291  ;;  %v1195_v7 = vmul.f32 %v1193_v18, %v1187_v5 }
 0xebd   :  { %v1294_v22 = vmul.f32 %v1292_v19, %v1287_v17 }
 0xebe   :  { %1197 = vrot.lane.b32.xlu0 %v1195_v7, %s1961_s19  ;;  %v1378_v7 = vstv %s1640_s0 }
 0xebf   :  { %1296 = vrot.lane.b32.xlu2 %v1294_v22, %s1960_s27 }
 0xf19   :  { %v1297_v1 = vpop.permute.xlu2 %1296 }
 0xf1a   :  { %v2637_v60 = vadd.f32 %v1297_v1, %v1289_v0 }
 0xf1c   :  { %1751 = vtanh.f32 %v2637_v60 }
 0xf22   :  { %v1752_v26 = vpop.eup %1751 }
 0xf23   :  { %1302 = vrot.lane.b32.xlu1 %v1752_v26, %s1960_s27 }
 0xf2b   :  { %1428 = vperm.xlu1 %1664, %v1643_v4  }
 0xf30   :  { %v1198_v50 = vpop.permute.xlu0 %1197 }
 0xf31   :  { %v2645_v51 = vadd.f32 %v1198_v50, %v1190_v27 }
 0xf33   :  { %1753 = vtanh.f32 %v2645_v51 }
 0xf34   :  { %1755 = vtanh.f32 %v1182_v52 }
 0xf39   :  { %v1754_v13 = vpop.eup %1753 }
 0xf3a   :  { %1203 = vrot.lane.b32.xlu2 %v1754_v13, %s1961_s19  ;;  %v1756_v25 = vpop.eup %1755 }
 0xf3b   :  { %v1186_v57 = vadd.f32 1.0, %v1756_v25 }
 0xf3d   :  { %v1188_v55 = vmul.f32 0.5, %v1186_v57 }
 0xf94   :  { %v1204_v16 = vpop.permute.xlu2 %1203 }
 0xf95   :  { %v1303_v28 = vpop.permute.xlu1 %1302  ;;  %v1206_v29 = vmul.f32 %v1204_v16, %v1188_v55 }
 0xf96   :  { %v1305_v31 = vmul.f32 %v1303_v28, %v1287_v17 }
 0xf97   :  { %v1209_v3 = vmul.f32 %v1208_v8, %v1206_v29  ;;  %1634 = vmatmul.msk.f32.vlgmr.msra.gmra.mxu2 %vm159_vm1, %v1206_v29  ;;  %1635 = vmatmul.msk.f32.vlgmr.msrb.gmra.mxu3 %vm159_vm1, %v1206_v29 }
 0xf98   :  { %1307 = vrot.lane.b32.xlu0 %v1305_v31, %s1961_s19  ;;  %1513 = vmatpush.msrb.mxu3 %v2559_v6 }
 0xf99   :  { %v2654_v33 = vadd.f32 %v1209_v3, %v2563_v20 }
 0xf9a   :  { %1514 = vmatpush.msrb.mxu3 %v2566_v23 }
 0xf9c   :  { %1515 = vmatpush.msrb.mxu3 %v2570_v63 }
 0xf9d   :  { %v1429_v36 = vpop.permute.xlu1 %1428 }
 0xf9e   :  { %1516 = vmatpush.msrb.mxu3 %v2574_v24  ;;  %v1431_v38 = vmul.f32 %v2530_v30, %v1429_v36  ;;  %v1555_v36 = vld [vmem:[%s2727_s11 + $0x20] sm:$0xff] }
 0xfa0   :  { %v1432_v23 = vadd.f32 %v2533_v32, %v1431_v38 }
0x100a   :  { %v1308_v34 = vpop.permute.xlu0 %1307 }
0x100b   :  { %1638 = vmatmul.msk.f32.vlgmr.msrb.gmra.mxu1 %vm223_vm0, %v1308_v34  ;;  %1639 = vmatmul.msk.f32.vlgmr.msrb.gmra.mxu0 %vm223_vm0, %v1308_v34 }
0x100c   :  { %1644 = vmatmul.msk.f32.vlgmr.msra.gmra.mxu3 %vm223_vm0, %v1308_v34 }
0x101a   :  { %v1251_v35 = vpop.f32.mrf.mxu3  ;;  %v1231_v42 = vpop.f32.mrf.mxu2 }
0x101b   :  { %v1252_v6 = vadd.f32 %v1251_v35, %v2284_v61  ;;  %v1232_v45 = vadd.f32 %v1231_v42, %v2289_v10  ;;  %v1557_v35 = vld [vmem:[%s2727_s11 + $0x30] sm:$0xff] }
0x1088   :  { %v1348_v37 = vpop.f32.mrf.mxu0  ;;  %v1328_v44 = vpop.f32.mrf.mxu1 }
0x1089   :  { %v1349_v20 = vadd.f32 %v1348_v37, %v1252_v6  ;;  %v1329_v30 = vadd.f32 %v1328_v44, %v1232_v45  ;;  %v1554_v6 = vld [vmem:[%s2727_s11 + $0x18] sm:$0xff]  ;;  %v1548_v44 = vstv %s1647_s20 }
0x108b   :  { %1757 = vtanh.f32 %v1349_v20  ;;  %v1351_v47 = vmul.f32 0.5, %v1329_v30  ;;  %v1352_v5 = vmul.f32 0.5, %v1349_v20 }
0x108f   :  { %v1450_v63 = vpop.f32.mrf.mxu3 }
0x1090   :  { %v1453_v24 = vadd.f32 %v1450_v63, %v1432_v23  ;;  %v1553_v63 = vld [vmem:[%s2727_s11 + $0x10] sm:$0xff] }
0x1091   :  { %v1758_v39 = vpop.eup %1757 }
0x1092   :  { %1759 = vtanh.f32 %v1453_v24  ;;  %1362 = vrot.lane.b32.xlu0 %v1758_v39, %s1961_s19  ;;  %v1454_v41 = vmul.f32 0.5, %v1453_v24  ;;  %v1552_v24 = vld [vmem:[%s2727_s11 + $0x8] sm:$0xff]  ;;  %v1551_v39 = vld [vmem:[%s2727_s11] sm:$0xff] }
0x1094   :  { %1761 = vtanh.f32 %v1454_v41 }
0x1095   :  { %1763 = vtanh.f32 %v1351_v47 }
0x1098   :  { %v1760_v40 = vpop.eup %1759 }
0x1099   :  { %1461 = vrot.lane.b32.xlu2 %v1760_v40, %s1960_s27 }
0x109a   :  { %v1762_v43 = vpop.eup %1761 }
0x109b   :  { %v1456_v46 = vadd.f32 1.0, %v1762_v43  ;;  %v1764_v53 = vpop.eup %1763 }
0x109c   :  { %v1355_v54 = vadd.f32 1.0, %v1764_v53 }
0x109d   :  { %v1457_v32 = vmul.f32 0.5, %v1456_v46 }
0x109e   :  { %v1357_v15 = vmul.f32 0.5, %v1355_v54 }
0x109f   :  { %v1459_v2 = vmul.f32 %v1457_v32, %v2637_v60 }
0x10a0   :  { %v1360_v58 = vmul.f32 %v1357_v15, %v2645_v51 }
0x10f3   :  { %v1462_v48 = vpop.permute.xlu2 %1461 }
0x10f4   :  { %v1464_v49 = vmul.f32 %v1462_v48, %v1457_v32 }
0x10f6   :  { %1466 = vrot.lane.b32.xlu1 %v1464_v49, %s1960_s27 }
0x1104   :  { %v1363_v11 = vpop.permute.xlu0 %1362 }
0x1105   :  { %v1365_v56 = vmul.f32 %v1363_v11, %v1357_v15 }
0x1107   :  { %1367 = vrot.lane.b32.xlu2 %v1365_v56, %s1961_s19 }
0x1161   :  { %v1368_v59 = vpop.permute.xlu2 %1367 }
0x1162   :  { %v1370_v62 = vadd.f32 %v1368_v59, %v1360_v58 }
0x1164   :  { %1765 = vtanh.f32 %v1370_v62 }
0x1168   :  { %v1467_v9 = vpop.permute.xlu1 %1466 }
0x1169   :  { %v1469_v12 = vadd.f32 %v1467_v9, %v1459_v2 }
0x116a   :  { %v1766_v21 = vpop.eup %1765 }
0x116b   :  { %1767 = vtanh.f32 %v1469_v12  ;;  %1373 = vrot.lane.b32.xlu1 %v1766_v21, %s1961_s19 }
0x116c   :  { %1769 = vtanh.f32 %v1352_v5 }
0x1171   :  { %v1768_v14 = vpop.eup %1767 }
0x1172   :  { %1472 = vrot.lane.b32.xlu0 %v1768_v14, %s1960_s27  ;;  %v1770_v17 = vpop.eup %1769 }
0x1173   :  { %v1356_v18 = vadd.f32 1.0, %v1770_v17 }
0x1175   :  { %v1358_v19 = vmul.f32 0.5, %v1356_v18 }
0x11dd   :  { %v1374_v22 = vpop.permute.xlu1 %1373 }
0x11de   :  { %v1376_v0 = vmul.f32 %v1374_v22, %v1358_v19 }
0x11e0   :  { %v1379_v1 = vmul.f32 %v1378_v7, %v1376_v0  ;;  %1641 = vmatmul.msk.f32.vlgmr.msra.gmra.mxu1 %vm159_vm1, %v1376_v0  ;;  %1642 = vmatmul.msk.f32.vlgmr.msrb.gmra.mxu2 %vm159_vm1, %v1376_v0 }
0x11e2   :  { %v1380_v60 = vadd.f32 %v1379_v1, %v2654_v33 }
0x11e4   :  { %v1473_v26 = vpop.permute.xlu0 %1472 }
0x11e5   :  { %v1475_v4 = vmul.f32 %v1473_v26, %v1457_v32  ;;  %v1560_v32 = vstv %s2729_s13 }
0x11e7   :  { %1477 = vrot.lane.b32.xlu2 %v1475_v4, %s1961_s19 }
0x1241   :  { %v1478_v27 = vpop.permute.xlu2 %1477 }
0x1242   :  { %1645 = vmatmul.msk.f32.vlgmr.msra.gmra.mxu0 %vm223_vm0, %v1478_v27  ;;  %1646 = vmatmul.msk.f32.vlgmr.msrb.gmra.mxu3 %vm223_vm0, %v1478_v27 }
0x125d   :  { %v1401_v57 = vpop.f32.mrf.mxu1 }
0x125e   :  { %v1402_v8 = vadd.f32 %v1401_v57, %v2289_v10  ;;  %v1556_v10 = vld [vmem:[%s2727_s11 + $0x28] sm:$0xff] }
0x1263   :  { %v1421_v50 = vpop.f32.mrf.mxu2 }
0x1264   :  { %v1422_v51 = vadd.f32 %v1421_v50, %v2284_v61  ;;  %v1558_v61 = vld [vmem:[%s2727_s11 + $0x38] sm:$0xff] }
0x1265   :  { %1572 = vmatpush.msrb.mxu0 %v1558_v61 }
0x1267   :  { %1573 = vmatpush.msrb.mxu0 %v1557_v35 }
0x1269   :  { %1574 = vmatpush.msrb.mxu0 %v1556_v10 }
0x126b   :  { %1575 = vmatpush.msrb.mxu0 %v1555_v36 }
0x126d   :  { %1576 = vmatpush.msrb.mxu0 %v1554_v6 }
0x126f   :  { %1577 = vmatpush.msrb.mxu0 %v1553_v63 }
0x1271   :  { %1578 = vmatpush.msrb.mxu0 %v1552_v24 }
0x1273   :  { %1579 = vmatpush.msrb.mxu0 %v1551_v39 }
0x12bf   :  { %v1498_v55 = vpop.f32.mrf.mxu0 }
0x12c0   :  { %v1499_v16 = vadd.f32 %v1498_v55, %v1402_v8 }
0x12c2   :  { %v1521_v28 = vmul.f32 0.5, %v1499_v16 }
0x12c5   :  { %v1518_v13 = vpop.f32.mrf.mxu3 }
0x12c6   :  { %v1519_v52 = vadd.f32 %v1518_v13, %v1422_v51 }
0x12c8   :  { %1771 = vtanh.f32 %v1519_v52  ;;  %v1522_v40 = vmul.f32 0.5, %v1519_v52 }
0x12c9   :  { %1773 = vtanh.f32 %v1521_v28 }
0x12ce   :  { %v1772_v25 = vpop.eup %1771 }
0x12cf   :  { %1532 = vrot.lane.b32.xlu0 %v1772_v25, %s1961_s19  ;;  %v1774_v29 = vpop.eup %1773 }
0x12d0   :  { %v1525_v31 = vadd.f32 1.0, %v1774_v29 }
0x12d2   :  { %v1527_v3 = vmul.f32 0.5, %v1525_v31 }
0x12d4   :  { %v1530_v37 = vmul.f32 %v1527_v3, %v1370_v62 }
0x1341   :  { %v1533_v33 = vpop.permute.xlu0 %1532 }
0x1342   :  { %v1535_v34 = vmul.f32 %v1533_v33, %v1527_v3 }
0x1344   :  { %1537 = vrot.lane.b32.xlu1 %v1535_v34, %s1961_s19 }
0x13b6   :  { %v1538_v20 = vpop.permute.xlu1 %1537 }
0x13b7   :  { %v1540_v38 = vadd.f32 %v1538_v20, %v1530_v37 }
0x13b9   :  { %1775 = vtanh.f32 %v1540_v38 }
0x13ba   :  { %1777 = vtanh.f32 %v1522_v40 }
0x13bf   :  { %v1776_v23 = vpop.eup %1775 }
0x13c0   :  { %1543 = vrot.lane.b32.xlu2 %v1776_v23, %s1961_s19  ;;  %v1778_v41 = vpop.eup %1777 }
0x13c1   :  { %v1526_v42 = vadd.f32 1.0, %v1778_v41 }
0x13c3   :  { %v1528_v43 = vmul.f32 0.5, %v1526_v42 }
0x141a   :  { %v1544_v45 = vpop.permute.xlu2 %1543 }
0x141b   :  { %v1546_v30 = vmul.f32 %v1544_v45, %v1528_v43 }
0x141d   :  { %v1549_v46 = vmul.f32 %v1548_v44, %v1546_v30 }
0x141f   :  { %v1550_v47 = vadd.f32 %v1549_v46, %v1380_v60 }
0x1421   :  { %1648 = vmatmul.msk.f32.vlgmr.msrb.gmra.mxu0 %vm159_vm1, %v1550_v47 }
0x149e   :  { %v1581_v48 = vpop.f32.mrf.mxu0 }
0x149f   :  { %v1582_v49 = vadd.f32 %v1581_v48, %v1560_v32 }
0x14a1   :  { %1585 = vst.msk [vmem:[%s2730_s14] sm:$0xff] %vm1584_vm2, %v1582_v49 }
0x14a2   :  { %1590 = vsyncpa [#allocation4], 1 }
0x14a3   :  { %1591 = vsyncpa [#allocation7], 1 }
0x14a4   :  { %1592 = vsyncpa [#allocation10], 1 }
0x14a5   :  { %1593 = vsyncpa [#allocation5], 1 }

</bundles_post_ra>
